<compile_context>
chip_gen: v7x
topology: tpu7x:2x2x1
jax: 0.10.0
libtpu: 0.0.40
codegen_flags: <defaults>
</compile_context>

<pallas_src>
import math
import jax
import jax.numpy as jnp
from jax import lax
from jax.experimental import pallas as pl
from jax.experimental.pallas import tpu as pltpu

D_MODEL = 32
N_HEADS = 4
D_HEAD = D_MODEL // N_HEADS
D_FF = 64
EPS = 1e-6
NEG_INF = -1e9


# ---------------------------------------------------------------- the kernel
def mdecoder_layer_kernel(
        x_ref, sent_ref, bias_sa_ref, bias_ca_ref,
        pbq_ref, pbkv_ref, pbqT_ref, hlmq_ref, hlmkv_ref, sum8_ref, expand8_ref,
        ln_a_ref, ln_b_ref,
        sa_wqkv_ref, sa_bqkv_ref, sa_wo_ref, sa_bo_ref,
        ca_wq_ref, ca_bq_ref, ca_wkv_ref, ca_bkv_ref, ca_wo_ref, ca_bo_ref,
        w1_ref, b1_ref, w2_ref, b2_ref,
        out_ref):
    D = D_MODEL
    scale = 1.0 / math.sqrt(D_HEAD)

    x = x_ref[...]              # [B*T, D]
    ln_a = ln_a_ref[...]        # [3, D]
    ln_b = ln_b_ref[...]        # [3, D]
    pbq = pbq_ref[...]          # [B*H*T, B*T]   row expansion (b,t) -> (b,h,t)
    pbqT = pbqT_ref[...]        # [B*T, B*H*T]   its transpose (precomputed)
    hlmq = hlmq_ref[...]        # [B*H*T, D]     head-lane selection mask for query rows
    hlmkv = hlmkv_ref[...]      # [B*H*S, D]     head-lane selection mask for key/value rows
    sum8 = sum8_ref[...]        # [D, D_HEAD]    lane fold  (h,d) -> d
    expand8 = expand8_ref[...]  # [D_HEAD, D]    lane expand d -> (h,d)

    def mm(a, b):
        return jnp.dot(a, b, preferred_element_type=jnp.float32)

    def layer_norm(v, a, b):
        """rtg LayerNorm: a * (v - mean) / (std + eps) + b, std unbiased."""
        d = v.shape[-1]
        mean = jnp.mean(v, axis=-1, keepdims=True)
        diff = v - mean
        var = jnp.sum(diff * diff, axis=-1, keepdims=True) * (1.0 / (d - 1))
        inv = pl.reciprocal(jnp.sqrt(var) + EPS, approx=True)   # EUP, ~free
        return a * diff * inv + b

    def attention(q_exp, k_exp, v_exp, hlm_kv, bias, wo, bo):
        """q_exp: [B*H*T, D] (row = (b,h,t), full-D lanes); k_exp/v_exp: [B*H*Tk, D].
        bias is the precomputed block-diagonal additive mask (-1e9 off-block)."""
        # fold head lanes: keep lanes of head(r), collapse to D_HEAD lanes
        qs = mm(q_exp * hlmq, sum8)              # [B*H*T,  D_HEAD]
        ks = mm(k_exp * hlm_kv, sum8)            # [B*H*Tk, D_HEAD]
        vs = mm(v_exp * hlm_kv, sum8)            # [B*H*Tk, D_HEAD]
        s = mm(qs, ks.T) * scale + bias          # [B*H*T, B*H*Tk], one MXU op
        s = s - jnp.max(s, axis=-1, keepdims=True)
        p = jnp.exp(s)                           # masked entries underflow to 0
        p = p * pl.reciprocal(jnp.sum(p, axis=-1, keepdims=True), approx=True)
        o = mm(p, vs)                            # [B*H*T, D_HEAD], one MXU op
        # (b,h,t) rows back to (b,t) rows x (h,d) lanes — stays in vregs, no scratch
        o_rows = mm(pbqT, mm(o, expand8) * hlmq)  # [B*T, D]
        return mm(o_rows, wo) + bo

    # ---- sublayer[0]: x + self_attn(LN(x), LN(x), LN(x), tgt_mask)
    h = layer_norm(x, ln_a[0:1, :], ln_b[0:1, :])
    h_exp = mm(pbq, h)                                            # [B*H*T, D]
    qkv = mm(h_exp, sa_wqkv_ref[...]) + sa_bqkv_ref[...]          # [B*H*T, 3D]
    x = x + attention(qkv[:, :D], qkv[:, D:2 * D], qkv[:, 2 * D:],
                      hlmq, bias_sa_ref[...], sa_wo_ref[...], sa_bo_ref[...])

    # ---- sublayer[1]: x + dec_block(LN(x), sent_repr)  (cross-attn over sent_repr)
    h = layer_norm(x, ln_a[1:2, :], ln_b[1:2, :])
    q_exp = mm(mm(pbq, h), ca_wq_ref[...]) + ca_bq_ref[...]       # [B*H*T, D]
    sent_exp = mm(pbkv_ref[...], sent_ref[...])                   # [B*H*S, D]
    kv = mm(sent_exp, ca_wkv_ref[...]) + ca_bkv_ref[...]          # [B*H*S, 2D]
    x = x + attention(q_exp, kv[:, :D], kv[:, D:],
                      hlmkv, bias_ca_ref[...], ca_wo_ref[...], ca_bo_ref[...])

    # ---- sublayer[2]: x + feed_fwd(LN(x)) = x + W2 @ relu(W1 @ LN(x) + b1) + b2
    h = layer_norm(x, ln_a[2:3, :], ln_b[2:3, :])
    ff = jnp.maximum(mm(h, w1_ref[...]) + b1_ref[...], 0.0)
    x = x + mm(ff, w2_ref[...]) + b2_ref[...]

    out_ref[...] = x


# ---------------------------------------------------------------- wrapper
def mdecoder_layer(x, tgt_mask, sent_repr, params):
    ln_a, ln_b, sa_w, sa_b, ca_w, ca_b, w1, b1, w2, b2 = params
    B, T, D = x.shape
    S = sent_repr.shape[1]
    H, Dh = N_HEADS, D_HEAD
    f32 = jnp.float32

    # --- fuse weights/biases once in the wrapper
    sa_wqkv = jnp.concatenate([sa_w[0], sa_w[1], sa_w[2]], axis=1)     # [D, 3D]
    sa_bqkv = jnp.concatenate([sa_b[0], sa_b[1], sa_b[2]])[None, :]    # [1, 3D]
    sa_wo, sa_bo = sa_w[3], sa_b[3][None, :]
    ca_wq, ca_bq = ca_w[0], ca_b[0][None, :]
    ca_wkv = jnp.concatenate([ca_w[1], ca_w[2]], axis=1)               # [D, 2D]
    ca_bkv = jnp.concatenate([ca_b[1], ca_b[2]])[None, :]              # [1, 2D]
    ca_wo, ca_bo = ca_w[3], ca_b[3][None, :]

    # --- stacked-attention layout constants (all built outside the kernel)
    # row expansion (b,t) -> (b,h,t): [B*H*T, B*T]
    pbq = jnp.kron(jnp.eye(B, dtype=f32), jnp.tile(jnp.eye(T, dtype=f32), (H, 1)))
    pbkv = jnp.kron(jnp.eye(B, dtype=f32), jnp.tile(jnp.eye(S, dtype=f32), (H, 1)))
    pbqT = pbq.T                                                        # [B*T, B*H*T]
    # head-lane selection: row (b,h,t) keeps lanes [h*Dh, (h+1)*Dh)
    hlmq = jnp.tile(jnp.kron(jnp.eye(H, dtype=f32), jnp.ones((T, Dh), f32)), (B, 1))
    hlmkv = jnp.tile(jnp.kron(jnp.eye(H, dtype=f32), jnp.ones((S, Dh), f32)), (B, 1))
    # lane fold [*, D] -> [*, Dh] and its transpose
    sum8 = jnp.tile(jnp.eye(Dh, dtype=f32), (H, 1))                     # [D, Dh]
    expand8 = sum8.T                                                    # [Dh, D]

    # block-diagonal additive attention biases: 0 on valid entries, -1e9 elsewhere
    eye_bh = jnp.eye(B * H, dtype=f32)
    keep_sa = jnp.repeat(tgt_mask.astype(f32), H, axis=0)               # [B*H, T, T]
    keep_sa = jnp.einsum('ij,itu->itju', eye_bh, keep_sa).reshape(B * H * T, B * H * T)
    bias_sa = jnp.where(keep_sa > 0.5, 0.0, NEG_INF).astype(f32)        # [BHT, BHT]
    keep_ca = jnp.kron(eye_bh, jnp.ones((T, S), f32))
    bias_ca = jnp.where(keep_ca > 0.5, 0.0, NEG_INF).astype(f32)        # [BHT, BHS]

    # fold batch into rows
    x2 = x.reshape(B * T, D)
    sent2 = sent_repr.reshape(B * S, D)

    args = (x2, sent2, bias_sa, bias_ca,
            pbq, pbkv, pbqT, hlmq, hlmkv, sum8, expand8,
            ln_a, ln_b,
            sa_wqkv, sa_bqkv, sa_wo, sa_bo,
            ca_wq, ca_bq, ca_wkv, ca_bkv, ca_wo, ca_bo,
            w1, b1, w2, b2)

    vmem_spec = pl.BlockSpec(memory_space=pltpu.MemorySpace.VMEM)
    cost = pl.CostEstimate(flops=2_000_000, transcendentals=9_000,
                           bytes_accessed=160_000)

    out2 = pl.pallas_call(
        mdecoder_layer_kernel,
        out_shape=jax.ShapeDtypeStruct((B * T, D), jnp.float32),
        in_specs=[vmem_spec] * len(args),
        out_specs=vmem_spec,
        cost_estimate=cost,
    )(*args)

    return out2.reshape(B, T, D)


# ---------------------------------------------------------------- pure-JAX reference
def reference(x, tgt_mask, sent_repr, params):
    ln_a, ln_b, sa_w, sa_b, ca_w, ca_b, w1, b1, w2, b2 = params
    hp = lax.Precision.HIGHEST

    def ln(x, a, b):
        d = x.shape[-1]
        mean = jnp.mean(x, axis=-1, keepdims=True)
        diff = x - mean
        var = jnp.sum(diff * diff, axis=-1, keepdims=True) / (d - 1)
        return a * diff / (jnp.sqrt(var) + EPS) + b

    def mha(q_in, kv_in, w, b, mask):
        B, Tq, D = q_in.shape
        Tk = kv_in.shape[1]
        q = jnp.einsum('btd,de->bte', q_in, w[0], precision=hp) + b[0]
        k = jnp.einsum('btd,de->bte', kv_in, w[1], precision=hp) + b[1]
        v = jnp.einsum('btd,de->bte', kv_in, w[2], precision=hp) + b[2]
        q = q.reshape(B, Tq, N_HEADS, D_HEAD).transpose(0, 2, 1, 3)
        k = k.reshape(B, Tk, N_HEADS, D_HEAD).transpose(0, 2, 1, 3)
        v = v.reshape(B, Tk, N_HEADS, D_HEAD).transpose(0, 2, 1, 3)
        s = jnp.einsum('bhqd,bhkd->bhqk', q, k, precision=hp) / math.sqrt(D_HEAD)
        if mask is not None:
            s = jnp.where(mask[:, None, :, :] == 0.0, NEG_INF, s)
        p = jax.nn.softmax(s, axis=-1)
        o = jnp.einsum('bhqk,bhkd->bhqd', p, v, precision=hp)
        o = o.transpose(0, 2, 1, 3).reshape(B, Tq, D)
        return jnp.einsum('btd,de->bte', o, w[3], precision=hp) + b[3]

    h = ln(x, ln_a[0], ln_b[0])
    x = x + mha(h, h, sa_w, sa_b, tgt_mask)
    h = ln(x, ln_a[1], ln_b[1])
    x = x + mha(h, sent_repr, ca_w, ca_b, None)
    h = ln(x, ln_a[2], ln_b[2])
    ff = jax.nn.relu(jnp.einsum('btd,df->btf', h, w1, precision=hp) + b1)
    x = x + jnp.einsum('btf,fd->btd', ff, w2, precision=hp) + b2
    return x


# ---------------------------------------------------------------- main
if __name__ == "__main__":
    key = jax.random.PRNGKey(0)
    ks = jax.random.split(key, 10)
    B, T, S = 2, 8, 8

    x = jax.random.normal(ks[0], (B, T, D_MODEL), jnp.float32)
    sent_repr = jax.random.normal(ks[1], (B, S, D_MODEL), jnp.float32)
    tgt_mask = jnp.broadcast_to(jnp.tril(jnp.ones((T, T), jnp.float32)), (B, T, T))

    sw = 1.0 / math.sqrt(D_MODEL)
    ln_a = jnp.ones((3, D_MODEL), jnp.float32)          # LayerNorm a_2 init
    ln_b = jnp.zeros((3, D_MODEL), jnp.float32)         # LayerNorm b_2 init
    sa_w = jax.random.normal(ks[2], (4, D_MODEL, D_MODEL), jnp.float32) * sw
    sa_b = jax.random.normal(ks[3], (4, D_MODEL), jnp.float32) * 0.02
    ca_w = jax.random.normal(ks[4], (4, D_MODEL, D_MODEL), jnp.float32) * sw
    ca_b = jax.random.normal(ks[5], (4, D_MODEL), jnp.float32) * 0.02
    w1 = jax.random.normal(ks[6], (D_MODEL, D_FF), jnp.float32) * sw
    b1 = jax.random.normal(ks[7], (1, D_FF), jnp.float32) * 0.02
    w2 = jax.random.normal(ks[8], (D_FF, D_MODEL), jnp.float32) * (1.0 / math.sqrt(D_FF))
    b2 = jax.random.normal(ks[9], (1, D_MODEL), jnp.float32) * 0.02
    params = (ln_a, ln_b, sa_w, sa_b, ca_w, ca_b, w1, b1, w2, b2)

    out = mdecoder_layer(x, tgt_mask, sent_repr, params)
    out = jax.block_until_ready(out)

    ref = reference(x, tgt_mask, sent_repr, params)
    assert out.shape == (B, T, D_MODEL)
    assert bool(jnp.all(jnp.isfinite(out)))
    max_err = float(jnp.max(jnp.abs(out - ref)))
    assert max_err < 2e-2, f"mismatch vs reference: {max_err}"
    print("KERNEL_OK")
</pallas_src>

<mosaic_0001>
module attributes {stable_mosaic.version = 11 : i64} {
  func.func @mdecoder_layer_kernel(%arg0: memref<16x32xf32, #tpu.memory_space<vmem>>, %arg1: memref<16x32xf32, #tpu.memory_space<vmem>>, %arg2: memref<64x64xf32, #tpu.memory_space<vmem>>, %arg3: memref<64x64xf32, #tpu.memory_space<vmem>>, %arg4: memref<64x16xf32, #tpu.memory_space<vmem>>, %arg5: memref<64x16xf32, #tpu.memory_space<vmem>>, %arg6: memref<16x64xf32, #tpu.memory_space<vmem>>, %arg7: memref<64x32xf32, #tpu.memory_space<vmem>>, %arg8: memref<64x32xf32, #tpu.memory_space<vmem>>, %arg9: memref<32x8xf32, #tpu.memory_space<vmem>>, %arg10: memref<8x32xf32, #tpu.memory_space<vmem>>, %arg11: memref<3x32xf32, #tpu.memory_space<vmem>>, %arg12: memref<3x32xf32, #tpu.memory_space<vmem>>, %arg13: memref<32x96xf32, #tpu.memory_space<vmem>>, %arg14: memref<1x96xf32, #tpu.memory_space<vmem>>, %arg15: memref<32x32xf32, #tpu.memory_space<vmem>>, %arg16: memref<1x32xf32, #tpu.memory_space<vmem>>, %arg17: memref<32x32xf32, #tpu.memory_space<vmem>>, %arg18: memref<1x32xf32, #tpu.memory_space<vmem>>, %arg19: memref<32x64xf32, #tpu.memory_space<vmem>>, %arg20: memref<1x64xf32, #tpu.memory_space<vmem>>, %arg21: memref<32x32xf32, #tpu.memory_space<vmem>>, %arg22: memref<1x32xf32, #tpu.memory_space<vmem>>, %arg23: memref<32x64xf32, #tpu.memory_space<vmem>>, %arg24: memref<1x64xf32, #tpu.memory_space<vmem>>, %arg25: memref<64x32xf32, #tpu.memory_space<vmem>>, %arg26: memref<1x32xf32, #tpu.memory_space<vmem>>, %arg27: memref<16x32xf32, #tpu.memory_space<vmem>>) attributes {dimension_semantics = [], scalar_prefetch = 0 : i64, scratch_operands = 0 : i64, tpu.core_type = #tpu.core_type<tc>} {
    %c0 = arith.constant 0 : index
    %c0_0 = arith.constant 0 : index
    %0 = vector.load %arg0[%c0, %c0_0] : memref<16x32xf32, #tpu.memory_space<vmem>>, vector<16x32xf32>
    %c0_1 = arith.constant 0 : index
    %c0_2 = arith.constant 0 : index
    %1 = vector.load %arg11[%c0_1, %c0_2] : memref<3x32xf32, #tpu.memory_space<vmem>>, vector<3x32xf32>
    %c0_3 = arith.constant 0 : index
    %c0_4 = arith.constant 0 : index
    %2 = vector.load %arg12[%c0_3, %c0_4] : memref<3x32xf32, #tpu.memory_space<vmem>>, vector<3x32xf32>
    %c0_5 = arith.constant 0 : index
    %c0_6 = arith.constant 0 : index
    %3 = vector.load %arg4[%c0_5, %c0_6] : memref<64x16xf32, #tpu.memory_space<vmem>>, vector<64x16xf32>
    %c0_7 = arith.constant 0 : index
    %c0_8 = arith.constant 0 : index
    %4 = vector.load %arg6[%c0_7, %c0_8] : memref<16x64xf32, #tpu.memory_space<vmem>>, vector<16x64xf32>
    %c0_9 = arith.constant 0 : index
    %c0_10 = arith.constant 0 : index
    %5 = vector.load %arg7[%c0_9, %c0_10] : memref<64x32xf32, #tpu.memory_space<vmem>>, vector<64x32xf32>
    %c0_11 = arith.constant 0 : index
    %c0_12 = arith.constant 0 : index
    %6 = vector.load %arg8[%c0_11, %c0_12] : memref<64x32xf32, #tpu.memory_space<vmem>>, vector<64x32xf32>
    %c0_13 = arith.constant 0 : index
    %c0_14 = arith.constant 0 : index
    %7 = vector.load %arg9[%c0_13, %c0_14] : memref<32x8xf32, #tpu.memory_space<vmem>>, vector<32x8xf32>
    %c0_15 = arith.constant 0 : index
    %c0_16 = arith.constant 0 : index
    %8 = vector.load %arg10[%c0_15, %c0_16] : memref<8x32xf32, #tpu.memory_space<vmem>>, vector<8x32xf32>
    %9 = vector.extract_strided_slice %1 {offsets = [0, 0], sizes = [1, 32], strides = [1, 1]} : vector<3x32xf32> to vector<1x32xf32>
    %10 = vector.extract_strided_slice %2 {offsets = [0, 0], sizes = [1, 32], strides = [1, 1]} : vector<3x32xf32> to vector<1x32xf32>
    %cst = arith.constant dense<0.000000e+00> : vector<16xf32>
    %11 = vector.multi_reduction <add>, %0, %cst [1] : vector<16x32xf32> to vector<16xf32>
    %12 = vector.shape_cast %11 : vector<16xf32> to vector<16x1xf32>
    %cst_17 = arith.constant 3.200000e+01 : f32
    %13 = vector.broadcast %cst_17 : f32 to vector<16x1xf32>
    %14 = arith.divf %12, %13 : vector<16x1xf32>
    %15 = vector.broadcast %14 : vector<16x1xf32> to vector<16x32xf32>
    %16 = arith.subf %0, %15 : vector<16x32xf32>
    %17 = arith.mulf %16, %16 : vector<16x32xf32>
    %cst_18 = arith.constant dense<0.000000e+00> : vector<16xf32>
    %18 = vector.multi_reduction <add>, %17, %cst_18 [1] : vector<16x32xf32> to vector<16xf32>
    %19 = vector.shape_cast %18 : vector<16xf32> to vector<16x1xf32>
    %cst_19 = arith.constant 0.0322580636 : f32
    %20 = vector.broadcast %cst_19 : f32 to vector<16x1xf32>
    %21 = arith.mulf %19, %20 : vector<16x1xf32>
    %22 = math.sqrt %21 : vector<16x1xf32>
    %cst_20 = arith.constant 9.99999997E-7 : f32
    %23 = vector.broadcast %cst_20 : f32 to vector<16x1xf32>
    %24 = arith.addf %22, %23 : vector<16x1xf32>
    %25 = tpu.reciprocal %24 {approx = true} : vector<16x1xf32> -> vector<16x1xf32>
    %26 = vector.broadcast %9 : vector<1x32xf32> to vector<16x32xf32>
    %27 = arith.mulf %26, %16 : vector<16x32xf32>
    %28 = vector.broadcast %25 : vector<16x1xf32> to vector<16x32xf32>
    %29 = arith.mulf %27, %28 : vector<16x32xf32>
    %30 = vector.broadcast %10 : vector<1x32xf32> to vector<16x32xf32>
    %31 = arith.addf %29, %30 : vector<16x32xf32>
    %cst_21 = arith.constant dense<0.000000e+00> : vector<64x32xf32>
    %32 = tpu.matmul %3, %31, %cst_21 {dimension_numbers = #tpu.dot_dimension_numbers<[1], [0], [0], [1], [0, 0, 1, 1], [], []>} : vector<64x16xf32>, vector<16x32xf32>, vector<64x32xf32> -> vector<64x32xf32>
    %c0_22 = arith.constant 0 : index
    %c0_23 = arith.constant 0 : index
    %33 = vector.load %arg13[%c0_22, %c0_23] : memref<32x96xf32, #tpu.memory_space<vmem>>, vector<32x96xf32>
    %cst_24 = arith.constant dense<0.000000e+00> : vector<64x96xf32>
    %34 = tpu.matmul %32, %33, %cst_24 {dimension_numbers = #tpu.dot_dimension_numbers<[1], [0], [0], [1], [0, 0, 1, 1], [], []>} : vector<64x32xf32>, vector<32x96xf32>, vector<64x96xf32> -> vector<64x96xf32>
    %c0_25 = arith.constant 0 : index
    %c0_26 = arith.constant 0 : index
    %35 = vector.load %arg14[%c0_25, %c0_26] : memref<1x96xf32, #tpu.memory_space<vmem>>, vector<1x96xf32>
    %36 = vector.broadcast %35 : vector<1x96xf32> to vector<64x96xf32>
    %37 = arith.addf %34, %36 : vector<64x96xf32>
    %38 = vector.extract_strided_slice %37 {offsets = [0, 0], sizes = [64, 32], strides = [1, 1]} : vector<64x96xf32> to vector<64x32xf32>
    %39 = vector.extract_strided_slice %37 {offsets = [0, 32], sizes = [64, 32], strides = [1, 1]} : vector<64x96xf32> to vector<64x32xf32>
    %40 = vector.extract_strided_slice %37 {offsets = [0, 64], sizes = [64, 32], strides = [1, 1]} : vector<64x96xf32> to vector<64x32xf32>
    %c0_27 = arith.constant 0 : index
    %c0_28 = arith.constant 0 : index
    %41 = vector.load %arg2[%c0_27, %c0_28] : memref<64x64xf32, #tpu.memory_space<vmem>>, vector<64x64xf32>
    %c0_29 = arith.constant 0 : index
    %c0_30 = arith.constant 0 : index
    %42 = vector.load %arg15[%c0_29, %c0_30] : memref<32x32xf32, #tpu.memory_space<vmem>>, vector<32x32xf32>
    %c0_31 = arith.constant 0 : index
    %c0_32 = arith.constant 0 : index
    %43 = vector.load %arg16[%c0_31, %c0_32] : memref<1x32xf32, #tpu.memory_space<vmem>>, vector<1x32xf32>
    %44 = arith.mulf %38, %5 : vector<64x32xf32>
    %cst_33 = arith.constant dense<0.000000e+00> : vector<64x8xf32>
    %45 = tpu.matmul %44, %7, %cst_33 {dimension_numbers = #tpu.dot_dimension_numbers<[1], [0], [0], [1], [0, 0, 1, 1], [], []>} : vector<64x32xf32>, vector<32x8xf32>, vector<64x8xf32> -> vector<64x8xf32>
    %46 = arith.mulf %39, %5 : vector<64x32xf32>
    %cst_34 = arith.constant dense<0.000000e+00> : vector<64x8xf32>
    %47 = tpu.matmul %46, %7, %cst_34 {dimension_numbers = #tpu.dot_dimension_numbers<[1], [0], [0], [1], [0, 0, 1, 1], [], []>} : vector<64x32xf32>, vector<32x8xf32>, vector<64x8xf32> -> vector<64x8xf32>
    %48 = arith.mulf %40, %5 : vector<64x32xf32>
    %cst_35 = arith.constant dense<0.000000e+00> : vector<64x8xf32>
    %49 = tpu.matmul %48, %7, %cst_35 {dimension_numbers = #tpu.dot_dimension_numbers<[1], [0], [0], [1], [0, 0, 1, 1], [], []>} : vector<64x32xf32>, vector<32x8xf32>, vector<64x8xf32> -> vector<64x8xf32>
    %50 = tpu.transpose %47, [1, 0] : vector<64x8xf32> -> vector<8x64xf32>
    %cst_36 = arith.constant dense<0.000000e+00> : vector<64x64xf32>
    %51 = tpu.matmul %45, %50, %cst_36 {dimension_numbers = #tpu.dot_dimension_numbers<[1], [0], [0], [1], [0, 0, 1, 1], [], []>} : vector<64x8xf32>, vector<8x64xf32>, vector<64x64xf32> -> vector<64x64xf32>
    %cst_37 = arith.constant 0.353553385 : f32
    %52 = vector.broadcast %cst_37 : f32 to vector<64x64xf32>
    %53 = arith.mulf %51, %52 : vector<64x64xf32>
    %54 = arith.addf %53, %41 : vector<64x64xf32>
    %cst_38 = arith.constant dense<0xFF800000> : vector<64xf32>
    %55 = vector.multi_reduction <maximumf>, %54, %cst_38 [1] : vector<64x64xf32> to vector<64xf32>
    %56 = vector.shape_cast %55 : vector<64xf32> to vector<64x1xf32>
    %57 = vector.broadcast %56 : vector<64x1xf32> to vector<64x64xf32>
    %58 = arith.subf %54, %57 : vector<64x64xf32>
    %59 = math.exp %58 : vector<64x64xf32>
    %cst_39 = arith.constant dense<0.000000e+00> : vector<64xf32>
    %60 = vector.multi_reduction <add>, %59, %cst_39 [1] : vector<64x64xf32> to vector<64xf32>
    %61 = vector.shape_cast %60 : vector<64xf32> to vector<64x1xf32>
    %62 = tpu.reciprocal %61 {approx = true} : vector<64x1xf32> -> vector<64x1xf32>
    %63 = vector.broadcast %62 : vector<64x1xf32> to vector<64x64xf32>
    %64 = arith.mulf %59, %63 : vector<64x64xf32>
    %cst_40 = arith.constant dense<0.000000e+00> : vector<64x8xf32>
    %65 = tpu.matmul %64, %49, %cst_40 {dimension_numbers = #tpu.dot_dimension_numbers<[1], [0], [0], [1], [0, 0, 1, 1], [], []>} : vector<64x64xf32>, vector<64x8xf32>, vector<64x8xf32> -> vector<64x8xf32>
    %cst_41 = arith.constant dense<0.000000e+00> : vector<64x32xf32>
    %66 = tpu.matmul %65, %8, %cst_41 {dimension_numbers = #tpu.dot_dimension_numbers<[1], [0], [0], [1], [0, 0, 1, 1], [], []>} : vector<64x8xf32>, vector<8x32xf32>, vector<64x32xf32> -> vector<64x32xf32>
    %67 = arith.mulf %66, %5 : vector<64x32xf32>
    %cst_42 = arith.constant dense<0.000000e+00> : vector<16x32xf32>
    %68 = tpu.matmul %4, %67, %cst_42 {dimension_numbers = #tpu.dot_dimension_numbers<[1], [0], [0], [1], [0, 0, 1, 1], [], []>} : vector<16x64xf32>, vector<64x32xf32>, vector<16x32xf32> -> vector<16x32xf32>
    %cst_43 = arith.constant dense<0.000000e+00> : vector<16x32xf32>
    %69 = tpu.matmul %68, %42, %cst_43 {dimension_numbers = #tpu.dot_dimension_numbers<[1], [0], [0], [1], [0, 0, 1, 1], [], []>} : vector<16x32xf32>, vector<32x32xf32>, vector<16x32xf32> -> vector<16x32xf32>
    %70 = vector.broadcast %43 : vector<1x32xf32> to vector<16x32xf32>
    %71 = arith.addf %69, %70 : vector<16x32xf32>
    %72 = arith.addf %0, %71 : vector<16x32xf32>
    %73 = vector.extract_strided_slice %1 {offsets = [1, 0], sizes = [1, 32], strides = [1, 1]} : vector<3x32xf32> to vector<1x32xf32>
    %74 = vector.extract_strided_slice %2 {offsets = [1, 0], sizes = [1, 32], strides = [1, 1]} : vector<3x32xf32> to vector<1x32xf32>
    %cst_44 = arith.constant dense<0.000000e+00> : vector<16xf32>
    %75 = vector.multi_reduction <add>, %72, %cst_44 [1] : vector<16x32xf32> to vector<16xf32>
    %76 = vector.shape_cast %75 : vector<16xf32> to vector<16x1xf32>
    %cst_45 = arith.constant 3.200000e+01 : f32
    %77 = vector.broadcast %cst_45 : f32 to vector<16x1xf32>
    %78 = arith.divf %76, %77 : vector<16x1xf32>
    %79 = vector.broadcast %78 : vector<16x1xf32> to vector<16x32xf32>
    %80 = arith.subf %72, %79 : vector<16x32xf32>
    %81 = arith.mulf %80, %80 : vector<16x32xf32>
    %cst_46 = arith.constant dense<0.000000e+00> : vector<16xf32>
    %82 = vector.multi_reduction <add>, %81, %cst_46 [1] : vector<16x32xf32> to vector<16xf32>
    %83 = vector.shape_cast %82 : vector<16xf32> to vector<16x1xf32>
    %cst_47 = arith.constant 0.0322580636 : f32
    %84 = vector.broadcast %cst_47 : f32 to vector<16x1xf32>
    %85 = arith.mulf %83, %84 : vector<16x1xf32>
    %86 = math.sqrt %85 : vector<16x1xf32>
    %cst_48 = arith.constant 9.99999997E-7 : f32
    %87 = vector.broadcast %cst_48 : f32 to vector<16x1xf32>
    %88 = arith.addf %86, %87 : vector<16x1xf32>
    %89 = tpu.reciprocal %88 {approx = true} : vector<16x1xf32> -> vector<16x1xf32>
    %90 = vector.broadcast %73 : vector<1x32xf32> to vector<16x32xf32>
    %91 = arith.mulf %90, %80 : vector<16x32xf32>
    %92 = vector.broadcast %89 : vector<16x1xf32> to vector<16x32xf32>
    %93 = arith.mulf %91, %92 : vector<16x32xf32>
    %94 = vector.broadcast %74 : vector<1x32xf32> to vector<16x32xf32>
    %95 = arith.addf %93, %94 : vector<16x32xf32>
    %cst_49 = arith.constant dense<0.000000e+00> : vector<64x32xf32>
    %96 = tpu.matmul %3, %95, %cst_49 {dimension_numbers = #tpu.dot_dimension_numbers<[1], [0], [0], [1], [0, 0, 1, 1], [], []>} : vector<64x16xf32>, vector<16x32xf32>, vector<64x32xf32> -> vector<64x32xf32>
    %c0_50 = arith.constant 0 : index
    %c0_51 = arith.constant 0 : index
    %97 = vector.load %arg17[%c0_50, %c0_51] : memref<32x32xf32, #tpu.memory_space<vmem>>, vector<32x32xf32>
    %cst_52 = arith.constant dense<0.000000e+00> : vector<64x32xf32>
    %98 = tpu.matmul %96, %97, %cst_52 {dimension_numbers = #tpu.dot_dimension_numbers<[1], [0], [0], [1], [0, 0, 1, 1], [], []>} : vector<64x32xf32>, vector<32x32xf32>, vector<64x32xf32> -> vector<64x32xf32>
    %c0_53 = arith.constant 0 : index
    %c0_54 = arith.constant 0 : index
    %99 = vector.load %arg18[%c0_53, %c0_54] : memref<1x32xf32, #tpu.memory_space<vmem>>, vector<1x32xf32>
    %100 = vector.broadcast %99 : vector<1x32xf32> to vector<64x32xf32>
    %101 = arith.addf %98, %100 : vector<64x32xf32>
    %c0_55 = arith.constant 0 : index
    %c0_56 = arith.constant 0 : index
    %102 = vector.load %arg5[%c0_55, %c0_56] : memref<64x16xf32, #tpu.memory_space<vmem>>, vector<64x16xf32>
    %c0_57 = arith.constant 0 : index
    %c0_58 = arith.constant 0 : index
    %103 = vector.load %arg1[%c0_57, %c0_58] : memref<16x32xf32, #tpu.memory_space<vmem>>, vector<16x32xf32>
    %cst_59 = arith.constant dense<0.000000e+00> : vector<64x32xf32>
    %104 = tpu.matmul %102, %103, %cst_59 {dimension_numbers = #tpu.dot_dimension_numbers<[1], [0], [0], [1], [0, 0, 1, 1], [], []>} : vector<64x16xf32>, vector<16x32xf32>, vector<64x32xf32> -> vector<64x32xf32>
    %c0_60 = arith.constant 0 : index
    %c0_61 = arith.constant 0 : index
    %105 = vector.load %arg19[%c0_60, %c0_61] : memref<32x64xf32, #tpu.memory_space<vmem>>, vector<32x64xf32>
    %cst_62 = arith.constant dense<0.000000e+00> : vector<64x64xf32>
    %106 = tpu.matmul %104, %105, %cst_62 {dimension_numbers = #tpu.dot_dimension_numbers<[1], [0], [0], [1], [0, 0, 1, 1], [], []>} : vector<64x32xf32>, vector<32x64xf32>, vector<64x64xf32> -> vector<64x64xf32>
    %c0_63 = arith.constant 0 : index
    %c0_64 = arith.constant 0 : index
    %107 = vector.load %arg20[%c0_63, %c0_64] : memref<1x64xf32, #tpu.memory_space<vmem>>, vector<1x64xf32>
    %108 = vector.broadcast %107 : vector<1x64xf32> to vector<64x64xf32>
    %109 = arith.addf %106, %108 : vector<64x64xf32>
    %110 = vector.extract_strided_slice %109 {offsets = [0, 0], sizes = [64, 32], strides = [1, 1]} : vector<64x64xf32> to vector<64x32xf32>
    %111 = vector.extract_strided_slice %109 {offsets = [0, 32], sizes = [64, 32], strides = [1, 1]} : vector<64x64xf32> to vector<64x32xf32>
    %c0_65 = arith.constant 0 : index
    %c0_66 = arith.constant 0 : index
    %112 = vector.load %arg3[%c0_65, %c0_66] : memref<64x64xf32, #tpu.memory_space<vmem>>, vector<64x64xf32>
    %c0_67 = arith.constant 0 : index
    %c0_68 = arith.constant 0 : index
    %113 = vector.load %arg21[%c0_67, %c0_68] : memref<32x32xf32, #tpu.memory_space<vmem>>, vector<32x32xf32>
    %c0_69 = arith.constant 0 : index
    %c0_70 = arith.constant 0 : index
    %114 = vector.load %arg22[%c0_69, %c0_70] : memref<1x32xf32, #tpu.memory_space<vmem>>, vector<1x32xf32>
    %115 = arith.mulf %101, %5 : vector<64x32xf32>
    %cst_71 = arith.constant dense<0.000000e+00> : vector<64x8xf32>
    %116 = tpu.matmul %115, %7, %cst_71 {dimension_numbers = #tpu.dot_dimension_numbers<[1], [0], [0], [1], [0, 0, 1, 1], [], []>} : vector<64x32xf32>, vector<32x8xf32>, vector<64x8xf32> -> vector<64x8xf32>
    %117 = arith.mulf %110, %6 : vector<64x32xf32>
    %cst_72 = arith.constant dense<0.000000e+00> : vector<64x8xf32>
    %118 = tpu.matmul %117, %7, %cst_72 {dimension_numbers = #tpu.dot_dimension_numbers<[1], [0], [0], [1], [0, 0, 1, 1], [], []>} : vector<64x32xf32>, vector<32x8xf32>, vector<64x8xf32> -> vector<64x8xf32>
    %119 = arith.mulf %111, %6 : vector<64x32xf32>
    %cst_73 = arith.constant dense<0.000000e+00> : vector<64x8xf32>
    %120 = tpu.matmul %119, %7, %cst_73 {dimension_numbers = #tpu.dot_dimension_numbers<[1], [0], [0], [1], [0, 0, 1, 1], [], []>} : vector<64x32xf32>, vector<32x8xf32>, vector<64x8xf32> -> vector<64x8xf32>
    %121 = tpu.transpose %118, [1, 0] : vector<64x8xf32> -> vector<8x64xf32>
    %cst_74 = arith.constant dense<0.000000e+00> : vector<64x64xf32>
    %122 = tpu.matmul %116, %121, %cst_74 {dimension_numbers = #tpu.dot_dimension_numbers<[1], [0], [0], [1], [0, 0, 1, 1], [], []>} : vector<64x8xf32>, vector<8x64xf32>, vector<64x64xf32> -> vector<64x64xf32>
    %cst_75 = arith.constant 0.353553385 : f32
    %123 = vector.broadcast %cst_75 : f32 to vector<64x64xf32>
    %124 = arith.mulf %122, %123 : vector<64x64xf32>
    %125 = arith.addf %124, %112 : vector<64x64xf32>
    %cst_76 = arith.constant dense<0xFF800000> : vector<64xf32>
    %126 = vector.multi_reduction <maximumf>, %125, %cst_76 [1] : vector<64x64xf32> to vector<64xf32>
    %127 = vector.shape_cast %126 : vector<64xf32> to vector<64x1xf32>
    %128 = vector.broadcast %127 : vector<64x1xf32> to vector<64x64xf32>
    %129 = arith.subf %125, %128 : vector<64x64xf32>
    %130 = math.exp %129 : vector<64x64xf32>
    %cst_77 = arith.constant dense<0.000000e+00> : vector<64xf32>
    %131 = vector.multi_reduction <add>, %130, %cst_77 [1] : vector<64x64xf32> to vector<64xf32>
    %132 = vector.shape_cast %131 : vector<64xf32> to vector<64x1xf32>
    %133 = tpu.reciprocal %132 {approx = true} : vector<64x1xf32> -> vector<64x1xf32>
    %134 = vector.broadcast %133 : vector<64x1xf32> to vector<64x64xf32>
    %135 = arith.mulf %130, %134 : vector<64x64xf32>
    %cst_78 = arith.constant dense<0.000000e+00> : vector<64x8xf32>
    %136 = tpu.matmul %135, %120, %cst_78 {dimension_numbers = #tpu.dot_dimension_numbers<[1], [0], [0], [1], [0, 0, 1, 1], [], []>} : vector<64x64xf32>, vector<64x8xf32>, vector<64x8xf32> -> vector<64x8xf32>
    %cst_79 = arith.constant dense<0.000000e+00> : vector<64x32xf32>
    %137 = tpu.matmul %136, %8, %cst_79 {dimension_numbers = #tpu.dot_dimension_numbers<[1], [0], [0], [1], [0, 0, 1, 1], [], []>} : vector<64x8xf32>, vector<8x32xf32>, vector<64x32xf32> -> vector<64x32xf32>
    %138 = arith.mulf %137, %5 : vector<64x32xf32>
    %cst_80 = arith.constant dense<0.000000e+00> : vector<16x32xf32>
    %139 = tpu.matmul %4, %138, %cst_80 {dimension_numbers = #tpu.dot_dimension_numbers<[1], [0], [0], [1], [0, 0, 1, 1], [], []>} : vector<16x64xf32>, vector<64x32xf32>, vector<16x32xf32> -> vector<16x32xf32>
    %cst_81 = arith.constant dense<0.000000e+00> : vector<16x32xf32>
    %140 = tpu.matmul %139, %113, %cst_81 {dimension_numbers = #tpu.dot_dimension_numbers<[1], [0], [0], [1], [0, 0, 1, 1], [], []>} : vector<16x32xf32>, vector<32x32xf32>, vector<16x32xf32> -> vector<16x32xf32>
    %141 = vector.broadcast %114 : vector<1x32xf32> to vector<16x32xf32>
    %142 = arith.addf %140, %141 : vector<16x32xf32>
    %143 = arith.addf %72, %142 : vector<16x32xf32>
    %144 = vector.extract_strided_slice %1 {offsets = [2, 0], sizes = [1, 32], strides = [1, 1]} : vector<3x32xf32> to vector<1x32xf32>
    %145 = vector.extract_strided_slice %2 {offsets = [2, 0], sizes = [1, 32], strides = [1, 1]} : vector<3x32xf32> to vector<1x32xf32>
    %cst_82 = arith.constant dense<0.000000e+00> : vector<16xf32>
    %146 = vector.multi_reduction <add>, %143, %cst_82 [1] : vector<16x32xf32> to vector<16xf32>
    %147 = vector.shape_cast %146 : vector<16xf32> to vector<16x1xf32>
    %cst_83 = arith.constant 3.200000e+01 : f32
    %148 = vector.broadcast %cst_83 : f32 to vector<16x1xf32>
    %149 = arith.divf %147, %148 : vector<16x1xf32>
    %150 = vector.broadcast %149 : vector<16x1xf32> to vector<16x32xf32>
    %151 = arith.subf %143, %150 : vector<16x32xf32>
    %152 = arith.mulf %151, %151 : vector<16x32xf32>
    %cst_84 = arith.constant dense<0.000000e+00> : vector<16xf32>
    %153 = vector.multi_reduction <add>, %152, %cst_84 [1] : vector<16x32xf32> to vector<16xf32>
    %154 = vector.shape_cast %153 : vector<16xf32> to vector<16x1xf32>
    %cst_85 = arith.constant 0.0322580636 : f32
    %155 = vector.broadcast %cst_85 : f32 to vector<16x1xf32>
    %156 = arith.mulf %154, %155 : vector<16x1xf32>
    %157 = math.sqrt %156 : vector<16x1xf32>
    %cst_86 = arith.constant 9.99999997E-7 : f32
    %158 = vector.broadcast %cst_86 : f32 to vector<16x1xf32>
    %159 = arith.addf %157, %158 : vector<16x1xf32>
    %160 = tpu.reciprocal %159 {approx = true} : vector<16x1xf32> -> vector<16x1xf32>
    %161 = vector.broadcast %144 : vector<1x32xf32> to vector<16x32xf32>
    %162 = arith.mulf %161, %151 : vector<16x32xf32>
    %163 = vector.broadcast %160 : vector<16x1xf32> to vector<16x32xf32>
    %164 = arith.mulf %162, %163 : vector<16x32xf32>
    %165 = vector.broadcast %145 : vector<1x32xf32> to vector<16x32xf32>
    %166 = arith.addf %164, %165 : vector<16x32xf32>
    %c0_87 = arith.constant 0 : index
    %c0_88 = arith.constant 0 : index
    %167 = vector.load %arg23[%c0_87, %c0_88] : memref<32x64xf32, #tpu.memory_space<vmem>>, vector<32x64xf32>
    %cst_89 = arith.constant dense<0.000000e+00> : vector<16x64xf32>
    %168 = tpu.matmul %166, %167, %cst_89 {dimension_numbers = #tpu.dot_dimension_numbers<[1], [0], [0], [1], [0, 0, 1, 1], [], []>} : vector<16x32xf32>, vector<32x64xf32>, vector<16x64xf32> -> vector<16x64xf32>
    %c0_90 = arith.constant 0 : index
    %c0_91 = arith.constant 0 : index
    %169 = vector.load %arg24[%c0_90, %c0_91] : memref<1x64xf32, #tpu.memory_space<vmem>>, vector<1x64xf32>
    %170 = vector.broadcast %169 : vector<1x64xf32> to vector<16x64xf32>
    %171 = arith.addf %168, %170 : vector<16x64xf32>
    %cst_92 = arith.constant 0.000000e+00 : f32
    %172 = vector.broadcast %cst_92 : f32 to vector<16x64xf32>
    %173 = arith.maximumf %171, %172 : vector<16x64xf32>
    %c0_93 = arith.constant 0 : index
    %c0_94 = arith.constant 0 : index
    %174 = vector.load %arg25[%c0_93, %c0_94] : memref<64x32xf32, #tpu.memory_space<vmem>>, vector<64x32xf32>
    %cst_95 = arith.constant dense<0.000000e+00> : vector<16x32xf32>
    %175 = tpu.matmul %173, %174, %cst_95 {dimension_numbers = #tpu.dot_dimension_numbers<[1], [0], [0], [1], [0, 0, 1, 1], [], []>} : vector<16x64xf32>, vector<64x32xf32>, vector<16x32xf32> -> vector<16x32xf32>
    %176 = arith.addf %143, %175 : vector<16x32xf32>
    %c0_96 = arith.constant 0 : index
    %c0_97 = arith.constant 0 : index
    %177 = vector.load %arg26[%c0_96, %c0_97] : memref<1x32xf32, #tpu.memory_space<vmem>>, vector<1x32xf32>
    %178 = vector.broadcast %177 : vector<1x32xf32> to vector<16x32xf32>
    %179 = arith.addf %176, %178 : vector<16x32xf32>
    %c0_98 = arith.constant 0 : index
    %c0_99 = arith.constant 0 : index
    %180 = vector.load %arg27[%c0_98, %c0_99] : memref<16x32xf32, #tpu.memory_space<vmem>>, vector<16x32xf32>
    tpu.vector_store %arg27[%c0_98, %c0_99], %179 {strides = array<i32>} : memref<16x32xf32, #tpu.memory_space<vmem>>, vector<16x32xf32>,
    return
  }
}

</mosaic_0001>

<bundles_post_ra>
// kernel: tpu_custom_call.1
= control target key start
LH: loop header
LB: loop body
LE: loop exit
PB: predicated region body
PF: predicated region fallthrough
CT: control target
= control target key end

     0   :  { %s5957_s0 = inlined_call_operand.vmem [shape: f32[16,32], index: 0, kind: input, shape index: {}]   ;;  %s5958_s1 = inlined_call_operand.vmem [shape: f32[16,32], index: 1, kind: input, shape index: {}]   ;;  %s5959_s2 = inlined_call_operand.vmem [shape: f32[64,64], index: 2, kind: input, shape index: {}]   ;;  %s5960_s3 = inlined_call_operand.vmem [shape: f32[64,64], index: 3, kind: input, shape index: {}]   ;;  %s5961_s4 = inlined_call_operand.vmem [shape: f32[64,16], index: 4, kind: input, shape index: {}]   ;;  %s5962_s5 = inlined_call_operand.vmem [shape: f32[64,16], index: 5, kind: input, shape index: {}]   ;;  %s5963_s6 = inlined_call_operand.vmem [shape: f32[16,64], index: 6, kind: input, shape index: {}]   ;;  %s5964_s7 = inlined_call_operand.vmem [shape: f32[64,32], index: 7, kind: input, shape index: {}]   ;;  %s5965_s8 = inlined_call_operand.vmem [shape: f32[64,32], index: 8, kind: input, shape index: {}]   ;;  %s5966_s9 = inlined_call_operand.vmem [shape: f32[32,8], index: 9, kind: input, shape index: {}]   ;;  %s5967_s10 = inlined_call_operand.vmem [shape: f32[8,32], index: 10, kind: input, shape index: {}]   ;;  %s5968_s11 = inlined_call_operand.vmem [shape: f32[3,32], index: 11, kind: input, shape index: {}]   ;;  %s5969_s12 = inlined_call_operand.vmem [shape: f32[3,32], index: 12, kind: input, shape index: {}]   ;;  %s5970_s13 = inlined_call_operand.vmem [shape: f32[32,96], index: 13, kind: input, shape index: {}]   ;;  %s5971_s14 = inlined_call_operand.vmem [shape: f32[1,96], index: 14, kind: input, shape index: {}]   ;;  %s5972_s15 = inlined_call_operand.vmem [shape: f32[32,32], index: 15, kind: input, shape index: {}]   ;;  %s5973_s16 = inlined_call_operand.vmem [shape: f32[1,32], index: 16, kind: input, shape index: {}]   ;;  %s5974_s17 = inlined_call_operand.vmem [shape: f32[32,32], index: 17, kind: input, shape index: {}]   ;;  %s5975_s18 = inlined_call_operand.vmem [shape: f32[1,32], index: 18, kind: input, shape index: {}]   ;;  %s5976_s19 = inlined_call_operand.vmem [shape: f32[32,64], index: 19, kind: input, shape index: {}]   ;;  %s5977_s20 = inlined_call_operand.vmem [shape: f32[1,64], index: 20, kind: input, shape index: {}]   ;;  %s5978_s21 = inlined_call_operand.vmem [shape: f32[32,32], index: 21, kind: input, shape index: {}]   ;;  %s5979_s22 = inlined_call_operand.vmem [shape: f32[1,32], index: 22, kind: input, shape index: {}]   ;;  %s5980_s23 = inlined_call_operand.vmem [shape: f32[32,64], index: 23, kind: input, shape index: {}]   ;;  %s5981_s24 = inlined_call_operand.vmem [shape: f32[1,64], index: 24, kind: input, shape index: {}]   ;;  %s5982_s25 = inlined_call_operand.vmem [shape: f32[64,32], index: 25, kind: input, shape index: {}]   ;;  %s5983_s26 = inlined_call_operand.vmem [shape: f32[1,32], index: 26, kind: input, shape index: {}]   ;;  %s5984_s27 = inlined_call_operand.hbm [shape: f32[16,32], index: 27, kind: output, shape index: {}]  }
   0x1   :  { %5997 = sst [smem:[#allocation5_spill]] %s5957_s0 }
   0x2   :  { %5998 = sst [smem:[#allocation6_spill]] %s5958_s1 }
   0x3   :  { %5999 = sst [smem:[#allocation7_spill]] %s5959_s2 }
   0x4   :  { %6000 = sst [smem:[#allocation8_spill]] %s5960_s3 }
   0x5   :  { %6001 = sst [smem:[#allocation9_spill]] %s5961_s4 }
   0x6   :  { %6002 = sst [smem:[#allocation10_spill]] %s5962_s5 }
   0x7   :  { %6003 = sst [smem:[#allocation11_spill]] %s5963_s6 }
   0x8   :  { %6004 = sst [smem:[#allocation12_spill]] %s5964_s7 }
   0x9   :  { %6005 = sst [smem:[#allocation13_spill]] %s5965_s8 }
   0xa   :  { %6006 = sst [smem:[#allocation14_spill]] %s5966_s9 }
   0xb   :  { %6007 = sst [smem:[#allocation15_spill]] %s5967_s10 }
   0xc   :  { %6008 = sst [smem:[#allocation16_spill]] %s5968_s11 }
   0xd   :  { %s6009_s8 = sld [smem:[#allocation5_spill]]  ;;  %vm122_vm0 = vcmask 261120  }
  0x13   :  { %v87_v0 = vld [vmem:[%s6009_s8] sm:$0xff]  ;;  %v88_v1 = vld [vmem:[%s6009_s8 + $0x8] sm:$0xff] }
  0x14   :  { %v123_v2 = vsel %vm122_vm0, %v87_v0, 0.0 }
  0x15   :  { %32 = vsyncpa [#allocation3], 0  ;;  %124 = vadd.xlane.f32.xlu0 %v123_v2  ;;  %v126_v3 = vsel %vm122_vm0, %v88_v1, 0.0  ;;  %s6010_s0 = sld [smem:[#allocation9_spill]]  ;;  %vm176_vm1 = vcmask 130048   ;;  %v306_v15 = vld [vmem:[%s5970_s13] sm:$0xff]  ;;  %v162_v27 = vlaneseq }
  0x16   :  { %v307_v16 = vld [vmem:[%s5970_s13 + $0x8] sm:$0xff]  ;;  %v308_v17 = vld [vmem:[%s5970_s13 + $0x10] sm:$0xff]  ;;  %v309_v19 = vld [vmem:[%s5970_s13 + $0x18] sm:$0xff]  ;;  %s6011_s30 = sld [smem:[#allocation16_spill]]  ;;  %s6012_s1 = sld [smem:[#allocation12_spill]]  ;;  %vm958_vm6 = vcmask 64512  }
  0x17   :  { %v4561_v18 = vpack.c.bf16 %v307_v16, %v306_v15  ;;  %v4565_v20 = vpack.c.bf16 %v309_v19, %v308_v17  ;;  %v5109_v34 = vshrl.u32 %v162_v27, 7  ;;  %v90_v43 = vld [vmem:[%s5969_s12] sm:$0x7]  ;;  %s4934_s2 = smov 32   ;;  %s6013_s28 = sld [smem:[#allocation14_spill]]  ;;  %vm5338_vm7 = vmpackc.low %vm958_vm6, %vm958_vm6  ;;  %vm1128_vm8 = vcmask 523264  }
  0x18   :  { %s6016_s9 = sld [smem:[#allocation7_spill]]  ;;  %s6018_s13 = sld [smem:[#allocation11_spill]] }
  0x19   :  { %127 = vadd.xlane.f32.xlu0 %v126_v3  ;;  %4562 = vmatprep.subr.bf16.mxu1 %v4561_v18  ;;  %v164_v39 = vsub.s32 0, %v5109_v34  ;;  %s6017_s3 = sld [smem:[#allocation15_spill]] }
  0x1a   :  { %4564 = vmatpush3.bf16.msra.mxu1 %v4561_v18 }
  0x1b   :  { %v5093_v14 = vld [vmem:[%s6010_s0] sm:$0xff]  ;;  %4566 = vmatprep.subr.bf16.mxu1 %v4565_v20  ;;  %v173_v47 = vrot.slane %v90_v43, %v164_v39  ;;  %v92_v53 = vld [vmem:[%s6010_s0 + $0x8] sm:$0xff]  ;;  %v93_v54 = vld [vmem:[%s6010_s0 + $0x10] sm:$0xff] }
  0x1c   :  { %4103 = vmatprep.mubr.msk.f32.mxu0 %vm176_vm1, %v5093_v14  ;;  %v89_v40 = vld [vmem:[%s6011_s30] sm:$0x7]  ;;  %v94_v55 = vld [vmem:[%s6010_s0 + $0x18] sm:$0xff]  ;;  %v96_v57 = vld [vmem:[%s6010_s0 + $0x28] sm:$0xff] }
  0x1d   :  { %v165_v41 = vrot.slane %v89_v40, %v164_v39  ;;  %v95_v56 = vld [vmem:[%s6010_s0 + $0x20] sm:$0xff]  ;;  %v97_v58 = vld [vmem:[%s6010_s0 + $0x30] sm:$0xff]  ;;  %v98_v59 = vld [vmem:[%s6010_s0 + $0x38] sm:$0xff] }
  0x1e   :  { %4568 = vmatpush3.bf16.msra.mxu1 %v4565_v20  ;;  %v5149_v60 = vld [vmem:[%s6012_s1 + $0x8] sm:$0xff]  ;;  %v5154_v61 = vld [vmem:[%s6012_s1] sm:$0xff]  ;;  %v5163_v62 = vld [vmem:[%s6012_s1 + $0x10] sm:$0xff] }
  0x1f   :  { %v5168_v63 = vld [vmem:[%s6012_s1 + $0x20] sm:$0xff]  ;;  %v5185_v3 = vld [vmem:[%s6012_s1 + $0x18] sm:$0xff]  ;;  %v119_v16 = vld [vmem:[%s6013_s28 + $0x10] sm:$0xff] }
  0x20   :  { %v120_v17 = vld [vmem:[%s6013_s28 + $0x18] sm:$0xff] }
  0x21   :  { %v5228_v18 = vpack.c.bf16 %v120_v17, %v119_v16 }
  0x2f   :  { %604 = vrot.lane.b32.xlu0 %v5154_v61, %s4934_s2 }
  0x33   :  { %612 = vrot.lane.b32.xlu0 %v5168_v63, %s4934_s2 }
  0xa2   :  { %v125_v4 = vpop.xlane.xlu0 %124 }
  0xa3   :  { %v130_v5 = vmul.f32 0.03125, %v125_v4  ;;  %v5190_v4 = vld [vmem:[%s6012_s1 + $0x30] sm:$0xff] }
  0xa4   :  { %616 = vrot.lane.b32.xlu0 %v5190_v4, %s4934_s2 }
  0xa5   :  { %v132_v6 = vsub.f32 %v87_v0, %v130_v5  ;;  %v117_v0 = vld [vmem:[%s6013_s28] sm:$0xff]  ;;  %v5202_v5 = vld [vmem:[%s6012_s1 + $0x28] sm:$0xff] }
  0xa6   :  { %v128_v7 = vpop.xlane.xlu0 %127 }
  0xa7   :  { %v131_v8 = vmul.f32 0.03125, %v128_v7  ;;  %v134_v9 = vmul.f32 %v132_v6, %v132_v6  ;;  %v166_v44 = vmul.f32 %v165_v41, %v132_v6  ;;  %v5209_v6 = vld [vmem:[%s6012_s1 + $0x38] sm:$0xff] }
  0xa9   :  { %v133_v10 = vsub.f32 %v88_v1, %v131_v8  ;;  %v136_v11 = vsel %vm122_vm0, %v134_v9, 0.0  ;;  %v118_v1 = vld [vmem:[%s6013_s28 + $0x8] sm:$0xff]  ;;  %s4936_s28 = smov 64  }
  0xaa   :  { %137 = vadd.xlane.f32.xlu1 %v136_v11  ;;  %v5176_v2 = vpack.c.bf16 %v118_v1, %v117_v0 }
  0xab   :  { %v135_v12 = vmul.f32 %v133_v10, %v133_v10  ;;  %v167_v45 = vmul.f32 %v165_v41, %v133_v10 }
  0xac   :  { %4578 = vmatprep.subr.bf16.mxu1 %v5176_v2 }
  0xad   :  { %v139_v13 = vsel %vm122_vm0, %v135_v12, 0.0 }
  0xae   :  { %140 = vadd.xlane.f32.xlu1 %v139_v13 }
  0xbf   :  { %606 = vrot.lane.b32.xlu1 %v5149_v60, %s4934_s2 }
  0xc3   :  { %608 = vrot.lane.b32.xlu1 %v5163_v62, %s4934_s2 }
  0xc7   :  { %610 = vrot.lane.b32.xlu1 %v5185_v3, %s4934_s2 }
  0xcb   :  { %614 = vrot.lane.b32.xlu1 %v5202_v5, %s4934_s2 }
  0xcf   :  { %618 = vrot.lane.b32.xlu1 %v5209_v6, %s4934_s2 }
 0x137   :  { %v138_v21 = vpop.xlane.xlu1 %137 }
 0x138   :  { %v142_v22 = vmul.f32 0.032258064, %v138_v21  ;;  %v3660_v21 = vld [vmem:[%s5971_s14] ss:$0 sm:$0xff]  ;;  %s4935_s14 = smov 96  }
 0x13a   :  { %4799 = vrsqrt.f32 %v142_v22  ;;  %vm146_vm2 = vcmp.eq.f32.partialorder %v142_v22, inf  ;;  %v149_v28 = vand.u32 2147483648, %v142_v22  ;;  %vm148_vm3 = vcmp.eq.f32.partialorder %v142_v22, 0.0 }
 0x13b   :  { %v141_v23 = vpop.xlane.xlu1 %140 }
 0x13c   :  { %v143_v24 = vmul.f32 0.032258064, %v141_v23 }
 0x13e   :  { %4801 = vrsqrt.f32 %v143_v24  ;;  %vm153_vm4 = vcmp.eq.f32.partialorder %v143_v24, inf  ;;  %v156_v35 = vand.u32 2147483648, %v143_v24  ;;  %vm155_vm5 = vcmp.eq.f32.partialorder %v143_v24, 0.0 }
 0x13f   :  { %v607_v19 = vpop.permute.xlu1 %606 }
 0x143   :  { %v609_v20 = vpop.permute.xlu1 %608 }
 0x144   :  { %v4800_v25 = vpop.eup %4799 }
 0x145   :  { %v145_v26 = vmul.f32 %v4800_v25, %v142_v22 }
 0x147   :  { %v147_v29 = vsel %vm146_vm2, %v142_v22, %v145_v26  ;;  %v611_v23 = vpop.permute.xlu1 %610  ;;  %v605_v26 = vpop.permute.xlu0 %604 }
 0x148   :  { %v4802_v30 = vpop.eup %4801  ;;  %v150_v31 = vsel %vm148_vm3, %v149_v28, %v147_v29 }
 0x149   :  { %v152_v32 = vmul.f32 %v4802_v30, %v143_v24  ;;  %v158_v33 = vadd.f32 1e-06, %v150_v31 }
 0x14b   :  { %v154_v36 = vsel %vm153_vm4, %v143_v24, %v152_v32  ;;  %4803 = vrcp.f32 %v158_v33  ;;  %v613_v40 = vpop.permute.xlu0 %612 }
 0x14c   :  { %v157_v37 = vsel %vm155_vm5, %v156_v35, %v154_v36 }
 0x14d   :  { %v159_v38 = vadd.f32 1e-06, %v157_v37  ;;  %v615_v37 = vpop.permute.xlu1 %614 }
 0x14f   :  { %4805 = vrcp.f32 %v159_v38 }
 0x155   :  { %v4804_v42 = vpop.eup %4803 }
 0x156   :  { %v168_v46 = vmul.f32 %v4804_v42, %v166_v44 }
 0x158   :  { %v174_v50 = vadd.f32 %v173_v47, %v168_v46 }
 0x159   :  { %v4806_v48 = vpop.eup %4805 }
 0x15a   :  { %v169_v49 = vmul.f32 %v4806_v48, %v167_v45 }
 0x15c   :  { %v175_v51 = vadd.f32 %v173_v47, %v169_v49 }
 0x15e   :  { %v4557_v52 = vpack.c.bf16 %v175_v51, %v174_v50 }
 0x160   :  { %4558 = vmatprep.subr.bf16.mxu0 %v4557_v52 }
 0x161   :  { %4560 = vmatpush3.bf16.msra.mxu0 %v4557_v52  ;;  %v619_v52 = vpop.permute.xlu1 %618 }
 0x162   :  { %4570 = vmatprep.subr.bf16.mxu0 %v5176_v2 }
 0x164   :  { %4104 = vmatmul.mubr.msk.f32.vlgmr.msra.gmra.mrb[0].mxu0 %vm176_vm1, %v92_v53 }
 0x165   :  { %4106 = vmatprep.mubr.msk.f32.mxu0 %vm176_vm1, %v93_v54  ;;  %4572 = vmatpush3.bf16.msra.mxu0 %v5176_v2 }
 0x166   :  { %4574 = vmatprep.subr.bf16.mxu0 %v5228_v18 }
 0x168   :  { %4107 = vmatmul.mubr.msk.f32.gmra.mrb[2].mxu0 %vm176_vm1, %v94_v55  ;;  %v617_v55 = vpop.permute.xlu0 %616 }
 0x169   :  { %4109 = vmatprep.mubr.msk.f32.mxu0 %vm176_vm1, %v95_v56  ;;  %4576 = vmatpush3.bf16.msra.mxu0 %v5228_v18 }
 0x16a   :  { %4586 = vmatprep.subr.bf16.mxu0 %v5176_v2 }
 0x16c   :  { %4110 = vmatmul.mubr.msk.f32.gmra.mrb[4].mxu0 %vm176_vm1, %v96_v57 }
 0x16d   :  { %4112 = vmatprep.mubr.msk.f32.mxu0 %vm176_vm1, %v97_v58 }
 0x170   :  { %4113 = vmatmul.mubr.msk.f32.gmra.mrb[6].mxu0 %vm176_vm1, %v98_v59 }
 0x237   :  { %v4105_v7 = vpop.f32.mrb[0].mxu0 }
 0x238   :  { %v267_v8 = vpop.f32.mrb[1].mxu0 }
 0x239   :  { %4123 = vmatprep.mubr.msk.f32.mxu1 %vm122_vm0, %v267_v8 }
 0x23a   :  { %4124 = vmatmul.mubr.msk.f32.vlgmr.msra.gmra.mrb[0].mxu1 %vm122_vm0, %v4105_v7 }
 0x23b   :  { %v4108_v9 = vpop.f32.mrb[2].mxu0  ;;  %4580 = vmatpush3.bf16.msra.mxu1 %v5176_v2 }
 0x23c   :  { %v277_v10 = vpop.f32.mrb[3].mxu0  ;;  %4582 = vmatprep.subr.bf16.mxu1 %v5228_v18 }
 0x23d   :  { %4126 = vmatprep.mubr.msk.f32.mxu1 %vm122_vm0, %v277_v10 }
 0x23e   :  { %4127 = vmatmul.mubr.msk.f32.gmra.mrb[2].mxu1 %vm122_vm0, %v4108_v9 }
 0x23f   :  { %v4111_v11 = vpop.f32.mrb[4].mxu0  ;;  %4584 = vmatpush3.bf16.msra.mxu1 %v5228_v18 }
 0x240   :  { %v287_v12 = vpop.f32.mrb[5].mxu0 }
 0x241   :  { %4129 = vmatprep.mubr.msk.f32.mxu1 %vm122_vm0, %v287_v12 }
 0x242   :  { %4130 = vmatmul.mubr.msk.f32.gmra.mrb[4].mxu1 %vm122_vm0, %v4111_v11 }
 0x243   :  { %v4114_v13 = vpop.f32.mrb[6].mxu0 }
 0x244   :  { %v297_v15 = vpop.f32.mrb[7].mxu0 }
 0x245   :  { %4132 = vmatprep.mubr.msk.f32.mxu1 %vm122_vm0, %v297_v15 }
 0x246   :  { %4133 = vmatmul.mubr.msk.f32.gmra.mrb[6].mxu1 %vm122_vm0, %v4114_v13 }
 0x30d   :  { %v4125_v22 = vpop.f32.mrb[0].mxu1 }
 0x30e   :  { %v5238_v24 = vadd.f32 %v4125_v22, %v3660_v21  ;;  %v407_v25 = vpop.f32.mrb[1].mxu1 }
 0x30f   :  { %v5240_v27 = vadd.f32 %v3660_v21, %v407_v25 }
 0x310   :  { %v629_v28 = vmul.f32 %v607_v19, %v5238_v24  ;;  %v460_v32 = vmul.f32 %v5238_v24, %v5149_v60 }
 0x311   :  { %v459_v29 = vmul.f32 %v5240_v27, %v5154_v61  ;;  %v628_v30 = vmul.f32 %v605_v26, %v5240_v27  ;;  %v4128_v31 = vpop.f32.mrb[2].mxu1 }
 0x312   :  { %v5248_v33 = vadd.f32 %v4128_v31, %v3660_v21  ;;  %v417_v35 = vpop.f32.mrb[3].mxu1  ;;  %646 = vrot.lane.b32.xlu1 %v629_v28, %s4935_s14 }
 0x313   :  { %v5251_v36 = vadd.f32 %v3660_v21, %v417_v35  ;;  %4143 = vmatprep.mubr.msk.f32.mxu0 %vm122_vm0, %v459_v29  ;;  %644 = vrot.lane.b32.xlu0 %v628_v30, %s4935_s14 }
 0x314   :  { %v462_v38 = vmul.f32 %v5248_v33, %v5185_v3  ;;  %v631_v39 = vmul.f32 %v611_v23, %v5248_v33  ;;  %4144 = vmatmul.mubr.msk.f32.vlgmr.msra.gmra.mrb[8].mxu0 %vm122_vm0, %v460_v32 }
 0x315   :  { %v461_v41 = vmul.f32 %v5251_v36, %v5163_v62  ;;  %v4131_v42 = vpop.f32.mrb[4].mxu1  ;;  %v630_v43 = vmul.f32 %v609_v20, %v5251_v36  ;;  %4588 = vmatpush3.bf16.msra.mxu0 %v5176_v2 }
 0x316   :  { %v5263_v44 = vadd.f32 %v4131_v42, %v3660_v21  ;;  %v427_v45 = vpop.f32.mrb[5].mxu1  ;;  %650 = vrot.lane.b32.xlu1 %v631_v39, %s4935_s14  ;;  %4590 = vmatprep.subr.bf16.mxu0 %v5228_v18 }
 0x317   :  { %v5267_v46 = vadd.f32 %v3660_v21, %v427_v45  ;;  %4146 = vmatprep.mubr.msk.f32.mxu0 %vm122_vm0, %v461_v41  ;;  %648 = vrot.lane.b32.xlu0 %v630_v43, %s4935_s14 }
 0x318   :  { %v464_v47 = vmul.f32 %v5263_v44, %v5202_v5  ;;  %v633_v48 = vmul.f32 %v615_v37, %v5263_v44  ;;  %4147 = vmatmul.mubr.msk.f32.gmra.mrb[10].mxu0 %vm122_vm0, %v462_v38 }
 0x319   :  { %v463_v49 = vmul.f32 %v5267_v46, %v5168_v63  ;;  %v632_v50 = vmul.f32 %v613_v40, %v5267_v46  ;;  %v4134_v51 = vpop.f32.mrb[6].mxu1  ;;  %4592 = vmatpush3.bf16.msra.mxu0 %v5228_v18 }
 0x31a   :  { %v443_v53 = vadd.f32 %v4134_v51, %v3660_v21  ;;  %v437_v54 = vpop.f32.mrb[7].mxu1  ;;  %654 = vrot.lane.b32.xlu1 %v633_v48, %s4935_s14 }
 0x31b   :  { %v438_v56 = vadd.f32 %v3660_v21, %v437_v54  ;;  %652 = vrot.lane.b32.xlu0 %v632_v50, %s4935_s14  ;;  %4149 = vmatprep.mubr.msk.f32.mxu0 %vm122_vm0, %v463_v49 }
 0x31c   :  { %v466_v57 = vmul.f32 %v443_v53, %v5209_v6  ;;  %v635_v58 = vmul.f32 %v619_v52, %v443_v53  ;;  %4150 = vmatmul.mubr.msk.f32.gmra.mrb[12].mxu0 %vm122_vm0, %v464_v47 }
 0x31d   :  { %v465_v59 = vmul.f32 %v438_v56, %v5190_v4  ;;  %v634_v0 = vmul.f32 %v617_v55, %v438_v56 }
 0x31e   :  { %658 = vrot.lane.b32.xlu1 %v635_v58, %s4935_s14 }
 0x31f   :  { %656 = vrot.lane.b32.xlu0 %v634_v0, %s4935_s14  ;;  %4152 = vmatprep.mubr.msk.f32.mxu0 %vm122_vm0, %v465_v59 }
 0x320   :  { %4153 = vmatmul.mubr.msk.f32.gmra.mrb[14].mxu0 %vm122_vm0, %v466_v57 }
 0x322   :  { %783 = vrot.lane.b32.xlu1 %v5149_v60, %s4936_s28 }
 0x323   :  { %781 = vrot.lane.b32.xlu0 %v5154_v61, %s4936_s28 }
 0x326   :  { %787 = vrot.lane.b32.xlu1 %v5185_v3, %s4936_s28 }
 0x327   :  { %785 = vrot.lane.b32.xlu0 %v5163_v62, %s4936_s28 }
 0x32a   :  { %791 = vrot.lane.b32.xlu1 %v5202_v5, %s4936_s28 }
 0x32b   :  { %789 = vrot.lane.b32.xlu0 %v5168_v63, %s4936_s28 }
 0x32e   :  { %795 = vrot.lane.b32.xlu1 %v5209_v6, %s4936_s28 }
 0x32f   :  { %793 = vrot.lane.b32.xlu0 %v5190_v4, %s4936_s28 }
 0x384   :  { %v647_v1 = vpop.permute.xlu1 %646 }
 0x385   :  { %v645_v7 = vpop.permute.xlu0 %644 }
 0x386   :  { %4163 = vmatprep.mubr.msk.f32.mxu1 %vm122_vm0, %v645_v7 }
 0x387   :  { %4164 = vmatmul.mubr.msk.f32.vlgmr.msra.gmra.mrb[8].mxu1 %vm122_vm0, %v647_v1 }
 0x388   :  { %v651_v8 = vpop.permute.xlu1 %650 }
 0x389   :  { %v649_v9 = vpop.permute.xlu0 %648 }
 0x38a   :  { %4166 = vmatprep.mubr.msk.f32.mxu1 %vm122_vm0, %v649_v9 }
 0x38b   :  { %4167 = vmatmul.mubr.msk.f32.gmra.mrb[10].mxu1 %vm122_vm0, %v651_v8 }
 0x38c   :  { %v655_v10 = vpop.permute.xlu1 %654 }
 0x38d   :  { %v653_v11 = vpop.permute.xlu0 %652 }
 0x38e   :  { %4169 = vmatprep.mubr.msk.f32.mxu1 %vm122_vm0, %v653_v11 }
 0x38f   :  { %4170 = vmatmul.mubr.msk.f32.gmra.mrb[12].mxu1 %vm122_vm0, %v655_v10 }
 0x390   :  { %v659_v12 = vpop.permute.xlu1 %658 }
 0x391   :  { %v657_v13 = vpop.permute.xlu0 %656 }
 0x392   :  { %4172 = vmatprep.mubr.msk.f32.mxu1 %vm122_vm0, %v657_v13 }
 0x393   :  { %4173 = vmatmul.mubr.msk.f32.gmra.mrb[14].mxu1 %vm122_vm0, %v659_v12 }
 0x394   :  { %v784_v15 = vpop.permute.xlu1 %783 }
 0x395   :  { %v806_v16 = vmul.f32 %v784_v15, %v5238_v24  ;;  %v782_v17 = vpop.permute.xlu0 %781 }
 0x396   :  { %v805_v19 = vmul.f32 %v782_v17, %v5240_v27 }
 0x397   :  { %823 = vrot.lane.b32.xlu1 %v806_v16, %s4936_s28 }
 0x398   :  { %v788_v20 = vpop.permute.xlu1 %787  ;;  %821 = vrot.lane.b32.xlu0 %v805_v19, %s4936_s28 }
 0x399   :  { %v808_v21 = vmul.f32 %v788_v20, %v5248_v33  ;;  %v786_v22 = vpop.permute.xlu0 %785 }
 0x39a   :  { %v807_v23 = vmul.f32 %v786_v22, %v5251_v36  ;;  %v447_v22 = vld [vmem:[%s6016_s9 + $0x8] sm:$0xff] }
 0x39b   :  { %827 = vrot.lane.b32.xlu1 %v808_v21, %s4936_s28 }
 0x39c   :  { %v792_v25 = vpop.permute.xlu1 %791  ;;  %825 = vrot.lane.b32.xlu0 %v807_v23, %s4936_s28 }
 0x39d   :  { %v810_v24 = vmul.f32 %v792_v25, %v5263_v44  ;;  %v790_v26 = vpop.permute.xlu0 %789 }
 0x39e   :  { %v809_v27 = vmul.f32 %v790_v26, %v5267_v46 }
 0x39f   :  { %831 = vrot.lane.b32.xlu1 %v810_v24, %s4936_s28  ;;  %v446_v24 = vld [vmem:[%s6016_s9] sm:$0xff] }
 0x3a0   :  { %v796_v28 = vpop.permute.xlu1 %795  ;;  %829 = vrot.lane.b32.xlu0 %v809_v27, %s4936_s28 }
 0x3a1   :  { %v812_v29 = vmul.f32 %v796_v28, %v443_v53  ;;  %v794_v30 = vpop.permute.xlu0 %793 }
 0x3a2   :  { %v811_v31 = vmul.f32 %v794_v30, %v438_v56  ;;  %v449_v30 = vld [vmem:[%s6016_s9 + $0x18] sm:$0xff] }
 0x3a3   :  { %835 = vrot.lane.b32.xlu1 %v812_v29, %s4936_s28 }
 0x3a4   :  { %833 = vrot.lane.b32.xlu0 %v811_v31, %s4936_s28  ;;  %s6020_s28 = sld [smem:[#allocation10_spill]] }
 0x3e7   :  { %v4145_v32 = vpop.f32.mrb[8].mxu0 }
 0x3e8   :  { %v557_v33 = vpop.f32.mrb[9].mxu0 }
 0x3e9   :  { %4211 = vmatprep.mubr.msk.f32.mxu1 %vm958_vm6, %v557_v33 }
 0x3eb   :  { %v4148_v35 = vpop.f32.mrb[10].mxu0 }
 0x3ec   :  { %v567_v36 = vpop.f32.mrb[11].mxu0 }
 0x3ef   :  { %v4151_v37 = vpop.f32.mrb[12].mxu0 }
 0x3f0   :  { %v577_v38 = vpop.f32.mrb[13].mxu0 }
 0x3f3   :  { %v4154_v39 = vpop.f32.mrb[14].mxu0 }
 0x3f4   :  { %v587_v40 = vpop.f32.mrb[15].mxu0 }
 0x409   :  { %v824_v41 = vpop.permute.xlu1 %823 }
 0x40a   :  { %v822_v42 = vpop.permute.xlu0 %821 }
 0x40b   :  { %4183 = vmatprep.mubr.msk.f32.mxu0 %vm122_vm0, %v822_v42 }
 0x40c   :  { %4184 = vmatmul.mubr.msk.f32.vlgmr.msra.gmra.mrb[16].mxu0 %vm122_vm0, %v824_v41 }
 0x40d   :  { %v828_v43 = vpop.permute.xlu1 %827 }
 0x40e   :  { %v826_v44 = vpop.permute.xlu0 %825 }
 0x40f   :  { %4186 = vmatprep.mubr.msk.f32.mxu0 %vm122_vm0, %v826_v44 }
 0x410   :  { %4187 = vmatmul.mubr.msk.f32.gmra.mrb[18].mxu0 %vm122_vm0, %v828_v43 }
 0x411   :  { %v832_v45 = vpop.permute.xlu1 %831 }
 0x412   :  { %v830_v46 = vpop.permute.xlu0 %829 }
 0x413   :  { %4189 = vmatprep.mubr.msk.f32.mxu0 %vm122_vm0, %v830_v46 }
 0x414   :  { %4190 = vmatmul.mubr.msk.f32.gmra.mrb[20].mxu0 %vm122_vm0, %v832_v45 }
 0x415   :  { %v836_v48 = vpop.permute.xlu1 %835 }
 0x416   :  { %v834_v47 = vpop.permute.xlu0 %833 }
 0x417   :  { %4192 = vmatprep.mubr.msk.f32.mxu0 %vm122_vm0, %v834_v47  ;;  %v450_v47 = vld [vmem:[%s6016_s9 + $0x20] sm:$0xff] }
 0x418   :  { %4193 = vmatmul.mubr.msk.f32.gmra.mrb[22].mxu0 %vm122_vm0, %v836_v48 }
 0x45a   :  { %v4165_v49 = vpop.f32.mrb[8].mxu1 }
 0x45b   :  { %v742_v50 = vpop.f32.mrb[9].mxu1 }
 0x45c   :  { %v4593_v52 = vpack.c.bf16 %v4165_v49, %v742_v50  ;;  %v453_v49 = vld [vmem:[%s6016_s9 + $0x38] sm:$0xff] }
 0x45e   :  { %v4168_v53 = vpop.f32.mrb[10].mxu1  ;;  %4595 = vmatprep.subr.msk.bf16.mxu1 %vm5338_vm7, %v4593_v52 }
 0x45f   :  { %v752_v54 = vpop.f32.mrb[11].mxu1  ;;  %4598 = vmatpush3.bf16.xpose.msk.msra.mxu1 %vm5338_vm7, %v4593_v52 }
 0x460   :  { %v4599_v55 = vpack.c.bf16 %v4168_v53, %v752_v54 }
 0x462   :  { %4601 = vmatprep.subr.msk.bf16.mxu1 %vm5338_vm7, %v4599_v55  ;;  %v4171_v56 = vpop.f32.mrb[12].mxu1 }
 0x463   :  { %v762_v57 = vpop.f32.mrb[13].mxu1 }
 0x464   :  { %v4605_v58 = vpack.c.bf16 %v4171_v56, %v762_v57 }
 0x466   :  { %v4174_v59 = vpop.f32.mrb[14].mxu1 }
 0x467   :  { %4604 = vmatpush3.bf16.xpose.msk.msra.mxu1 %vm5338_vm7, %v4599_v55  ;;  %v772_v0 = vpop.f32.mrb[15].mxu1 }
 0x468   :  { %4607 = vmatprep.subr.msk.bf16.mxu1 %vm5338_vm7, %v4605_v58  ;;  %v4611_v1 = vpack.c.bf16 %v4174_v59, %v772_v0 }
 0x46f   :  { %4610 = vmatpush3.bf16.xpose.msk.msra.mxu1 %vm5338_vm7, %v4605_v58  ;;  %v452_v58 = vld [vmem:[%s6016_s9 + $0x30] sm:$0xff] }
 0x470   :  { %4613 = vmatprep.subr.msk.bf16.mxu1 %vm5338_vm7, %v4611_v1 }
 0x477   :  { %4616 = vmatpush3.bf16.xpose.msk.msra.mxu1 %vm5338_vm7, %v4611_v1 }
 0x47e   :  { %4212 = vmatmul.mubr.msk.f32.vlgmr.msra.gmra.mrb[16].mxu1 %vm958_vm6, %v4145_v32 }
 0x47f   :  { %4214 = vmatprep.mubr.msk.f32.mxu1 %vm958_vm6, %v567_v36 }
 0x482   :  { %4215 = vmatmul.mubr.msk.f32.gmra.mrb[18].mxu1 %vm958_vm6, %v4148_v35 }
 0x483   :  { %4217 = vmatprep.mubr.msk.f32.mxu1 %vm958_vm6, %v577_v38  ;;  %v448_v38 = vld [vmem:[%s6016_s9 + $0x10] sm:$0xff] }
 0x486   :  { %4218 = vmatmul.mubr.msk.f32.gmra.mrb[20].mxu1 %vm958_vm6, %v4151_v37 }
 0x487   :  { %4220 = vmatprep.mubr.msk.f32.mxu1 %vm958_vm6, %v587_v40  ;;  %v451_v40 = vld [vmem:[%s6016_s9 + $0x28] sm:$0xff] }
 0x48a   :  { %4221 = vmatmul.mubr.msk.f32.gmra.mrb[22].mxu1 %vm958_vm6, %v4154_v39 }
 0x4df   :  { %v4185_v7 = vpop.f32.mrb[16].mxu0 }
 0x4e0   :  { %v919_v8 = vpop.f32.mrb[17].mxu0 }
 0x4e1   :  { %v4617_v9 = vpack.c.bf16 %v4185_v7, %v919_v8 }
 0x4e3   :  { %v4188_v10 = vpop.f32.mrb[18].mxu0  ;;  %4618 = vmatprep.subr.bf16.mxu0 %v4617_v9 }
 0x4e4   :  { %v929_v11 = vpop.f32.mrb[19].mxu0  ;;  %4620 = vmatpush3.bf16.msra.mxu0 %v4617_v9 }
 0x4e5   :  { %v4621_v12 = vpack.c.bf16 %v4188_v10, %v929_v11 }
 0x4e7   :  { %v4191_v13 = vpop.f32.mrb[20].mxu0  ;;  %4622 = vmatprep.subr.bf16.mxu0 %v4621_v12 }
 0x4e8   :  { %v939_v15 = vpop.f32.mrb[21].mxu0  ;;  %4624 = vmatpush3.bf16.msra.mxu0 %v4621_v12 }
 0x4e9   :  { %v4625_v16 = vpack.c.bf16 %v4191_v13, %v939_v15 }
 0x4eb   :  { %v4194_v17 = vpop.f32.mrb[22].mxu0  ;;  %4626 = vmatprep.subr.bf16.mxu0 %v4625_v16 }
 0x4ec   :  { %v949_v19 = vpop.f32.mrb[23].mxu0  ;;  %4628 = vmatpush3.bf16.msra.mxu0 %v4625_v16 }
 0x4ed   :  { %v4629_v20 = vpack.c.bf16 %v4194_v17, %v949_v19 }
 0x4ef   :  { %4630 = vmatprep.subr.bf16.mxu0 %v4629_v20 }
 0x4f0   :  { %4632 = vmatpush3.bf16.msra.mxu0 %v4629_v20 }
 0x551   :  { %v4213_v21 = vpop.f32.mrb[16].mxu1 }
 0x552   :  { %v1113_v23 = vmul.f32 0.35355338, %v4213_v21  ;;  %v1073_v25 = vpop.f32.mrb[17].mxu1 }
 0x553   :  { %v1112_v26 = vmul.f32 0.35355338, %v1073_v25 }
 0x554   :  { %v1121_v27 = vadd.f32 %v1113_v23, %v447_v22 }
 0x555   :  { %v4216_v28 = vpop.f32.mrb[18].mxu1  ;;  %v1120_v29 = vadd.f32 %v1112_v26, %v446_v24 }
 0x556   :  { %v1115_v31 = vmul.f32 0.35355338, %v4216_v28  ;;  %v1083_v32 = vpop.f32.mrb[19].mxu1  ;;  %v1132_v33 = vsel %vm1128_vm8, %v1121_v27, -inf }
 0x557   :  { %v1114_v35 = vmul.f32 0.35355338, %v1083_v32  ;;  %1133 = vmax.xlane.f32.xlu1 %v1132_v33  ;;  %v1129_v36 = vsel %vm1128_vm8, %v1120_v29, -inf }
 0x558   :  { %1130 = vmax.xlane.f32.xlu0 %v1129_v36  ;;  %v1123_v37 = vadd.f32 %v1115_v31, %v449_v30 }
 0x559   :  { %v4219_v39 = vpop.f32.mrb[20].mxu1  ;;  %v1122_v45 = vadd.f32 %v1114_v35, %v448_v38 }
 0x55a   :  { %v1117_v41 = vmul.f32 0.35355338, %v4219_v39  ;;  %v1093_v42 = vpop.f32.mrb[21].mxu1  ;;  %v1138_v43 = vsel %vm1128_vm8, %v1123_v37, -inf }
 0x55b   :  { %v1116_v44 = vmul.f32 0.35355338, %v1093_v42  ;;  %v1135_v55 = vsel %vm1128_vm8, %v1122_v45, -inf }
 0x55c   :  { %1139 = vmax.xlane.f32.xlu0 %v1138_v43  ;;  %v1125_v46 = vadd.f32 %v1117_v41, %v451_v40 }
 0x55d   :  { %v4222_v48 = vpop.f32.mrb[22].mxu1  ;;  %v1124_v56 = vadd.f32 %v1116_v44, %v450_v47 }
 0x55e   :  { %v1119_v50 = vmul.f32 0.35355338, %v4222_v48  ;;  %v1103_v52 = vpop.f32.mrb[23].mxu1  ;;  %v1144_v53 = vsel %vm1128_vm8, %v1125_v46, -inf }
 0x55f   :  { %v1118_v54 = vmul.f32 0.35355338, %v1103_v52  ;;  %1145 = vmax.xlane.f32.xlu1 %v1144_v53  ;;  %v1141_v0 = vsel %vm1128_vm8, %v1124_v56, -inf  ;;  %v5408_v52 = vld [vmem:[%s6017_s3] sm:$0xff] }
 0x560   :  { %1136 = vmax.xlane.f32.xlu0 %v1135_v55  ;;  %v1127_v57 = vadd.f32 %v1119_v50, %v453_v49  ;;  %4251 = vmatprep.subr.mxu0 %v5408_v52 }
 0x561   :  { %v1126_v1 = vadd.f32 %v1118_v54, %v452_v58 }
 0x562   :  { %v1150_v59 = vsel %vm1128_vm8, %v1127_v57, -inf }
 0x563   :  { %1151 = vmax.xlane.f32.xlu1 %v1150_v59  ;;  %v1147_v7 = vsel %vm1128_vm8, %v1126_v1, -inf }
 0x564   :  { %1142 = vmax.xlane.f32.xlu0 %v1141_v0 }
 0x568   :  { %1148 = vmax.xlane.f32.xlu0 %v1147_v7 }
 0x5e4   :  { %v1134_v8 = vpop.xlane.xlu1 %1133 }
 0x5e5   :  { %v1154_v9 = vsub.f32 %v1121_v27, %v1134_v8  ;;  %v1131_v10 = vpop.xlane.xlu0 %1130 }
 0x5e6   :  { %v1153_v11 = vsub.f32 %v1120_v29, %v1131_v10 }
 0x5e7   :  { %v1163_v12 = vmul.f32 1.442695, %v1154_v9 }
 0x5e8   :  { %v1161_v13 = vmul.f32 1.442695, %v1153_v11 }
 0x5e9   :  { %4807 = vpow2.f32 %v1163_v12  ;;  %v1140_v15 = vpop.xlane.xlu0 %1139 }
 0x5ea   :  { %4809 = vpow2.f32 %v1161_v13  ;;  %v1156_v16 = vsub.f32 %v1123_v37, %v1140_v15 }
 0x5ec   :  { %v1167_v17 = vmul.f32 1.442695, %v1156_v16  ;;  %v1146_v19 = vpop.xlane.xlu1 %1145 }
 0x5ed   :  { %v1158_v20 = vsub.f32 %v1125_v46, %v1146_v19  ;;  %v1137_v21 = vpop.xlane.xlu0 %1136 }
 0x5ee   :  { %4811 = vpow2.f32 %v1167_v17  ;;  %v1155_v22 = vsub.f32 %v1122_v45, %v1137_v21 }
 0x5ef   :  { %v1171_v23 = vmul.f32 1.442695, %v1158_v20 }
 0x5f0   :  { %v1165_v25 = vmul.f32 1.442695, %v1155_v22  ;;  %v1152_v24 = vpop.xlane.xlu1 %1151 }
 0x5f1   :  { %4813 = vpow2.f32 %v1171_v23  ;;  %v1160_v26 = vsub.f32 %v1127_v57, %v1152_v24  ;;  %v1143_v27 = vpop.xlane.xlu0 %1142 }
 0x5f2   :  { %4815 = vpow2.f32 %v1165_v25  ;;  %v1157_v28 = vsub.f32 %v1124_v56, %v1143_v27 }
 0x5f3   :  { %v4808_v29 = vpop.eup %4807  ;;  %v1175_v30 = vmul.f32 1.442695, %v1160_v26 }
 0x5f4   :  { %v4810_v31 = vpop.eup %4809  ;;  %v1169_v32 = vmul.f32 1.442695, %v1157_v28  ;;  %v1180_v33 = vsel %vm1128_vm8, %v4808_v29, 0.0 }
 0x5f5   :  { %4817 = vpow2.f32 %v1175_v30  ;;  %1181 = vadd.xlane.f32.xlu1 %v1180_v33  ;;  %v1149_v35 = vpop.xlane.xlu0 %1148  ;;  %v1177_v36 = vsel %vm1128_vm8, %v4810_v31, 0.0  ;;  %v454_v33 = vld [vmem:[%s5972_s15] sm:$0xff] }
 0x5f6   :  { %4819 = vpow2.f32 %v1169_v32  ;;  %v1159_v37 = vsub.f32 %v1126_v1, %v1149_v35  ;;  %1178 = vadd.xlane.f32.xlu0 %v1177_v36  ;;  %v5431_v32 = vld [vmem:[%s6018_s13] sm:$0xff]  ;;  %v455_v35 = vld [vmem:[%s5972_s15 + $0x8] sm:$0xff]  ;;  %v456_v36 = vld [vmem:[%s5972_s15 + $0x10] sm:$0xff] }
 0x5f8   :  { %v4812_v38 = vpop.eup %4811  ;;  %v1173_v39 = vmul.f32 1.442695, %v1159_v37  ;;  %v4649_v37 = vpack.c.bf16 %v455_v35, %v454_v33 }
 0x5f9   :  { %v1186_v40 = vsel %vm1128_vm8, %v4812_v38, 0.0 }
 0x5fa   :  { %4821 = vpow2.f32 %v1173_v39  ;;  %1187 = vadd.xlane.f32.xlu1 %v1186_v40  ;;  %4650 = vmatprep.subr.bf16.mxu1 %v4649_v37 }
 0x5fb   :  { %v4814_v41 = vpop.eup %4813  ;;  %4652 = vmatpush3.bf16.msra.mxu1 %v4649_v37 }
 0x5fc   :  { %v4816_v42 = vpop.eup %4815  ;;  %v1192_v43 = vsel %vm1128_vm8, %v4814_v41, 0.0 }
 0x5fd   :  { %v1183_v44 = vsel %vm1128_vm8, %v4816_v42, 0.0 }
 0x5fe   :  { %1193 = vadd.xlane.f32.xlu1 %v1192_v43  ;;  %1184 = vadd.xlane.f32.xlu0 %v1183_v44 }
 0x5ff   :  { %v4818_v45 = vpop.eup %4817 }
 0x600   :  { %v4820_v46 = vpop.eup %4819  ;;  %v1198_v47 = vsel %vm1128_vm8, %v4818_v45, 0.0 }
 0x601   :  { %v1189_v48 = vsel %vm1128_vm8, %v4820_v46, 0.0 }
 0x602   :  { %1199 = vadd.xlane.f32.xlu1 %v1198_v47  ;;  %1190 = vadd.xlane.f32.xlu0 %v1189_v48 }
 0x604   :  { %v4822_v49 = vpop.eup %4821 }
 0x605   :  { %v1195_v50 = vsel %vm1128_vm8, %v4822_v49, 0.0 }
 0x606   :  { %1196 = vadd.xlane.f32.xlu0 %v1195_v50 }
 0x682   :  { %v1182_v53 = vpop.xlane.xlu1 %1181 }
 0x683   :  { %4823 = vrcp.f32 %v1182_v53  ;;  %v1179_v54 = vpop.xlane.xlu0 %1178 }
 0x684   :  { %4825 = vrcp.f32 %v1179_v54 }
 0x687   :  { %v1188_v55 = vpop.xlane.xlu1 %1187 }
 0x688   :  { %4827 = vrcp.f32 %v1188_v55 }
 0x68b   :  { %v1194_v56 = vpop.xlane.xlu1 %1193  ;;  %v1185_v57 = vpop.xlane.xlu0 %1184 }
 0x68c   :  { %4829 = vrcp.f32 %v1185_v57 }
 0x68d   :  { %v4824_v58 = vpop.eup %4823  ;;  %4831 = vrcp.f32 %v1194_v56 }
 0x68e   :  { %v4826_v59 = vpop.eup %4825  ;;  %v1210_v7 = vmul.f32 %v4824_v58, %v4808_v29 }
 0x68f   :  { %v1191_v0 = vpop.xlane.xlu0 %1190  ;;  %v1209_v1 = vmul.f32 %v4826_v59, %v4810_v31  ;;  %v1200_v8 = vpop.xlane.xlu1 %1199 }
 0x690   :  { %4833 = vrcp.f32 %v1191_v0 }
 0x691   :  { %4239 = vmatprep.mubr.msk.f32.mxu0 %vm1128_vm8, %v1209_v1  ;;  %4835 = vrcp.f32 %v1200_v8 }
 0x692   :  { %4240 = vmatmul.mubr.msk.f32.vlgmr.msra.gmra.mrb[24].mxu0 %vm1128_vm8, %v1210_v7  ;;  %v4828_v10 = vpop.eup %4827  ;;  %v4887_v7 = vld [vmem:[%s6009_s8 + $0x8] sm:$0xff] }
 0x693   :  { %v1197_v9 = vpop.xlane.xlu0 %1196  ;;  %4252 = vmatpush3.msra.mxu0 %v5408_v52  ;;  %v1212_v13 = vmul.f32 %v4828_v10, %v4812_v38  ;;  %v457_v38 = vld [vmem:[%s5972_s15 + $0x18] sm:$0xff] }
 0x694   :  { %4837 = vrcp.f32 %v1197_v9  ;;  %v4653_v39 = vpack.c.bf16 %v457_v38, %v456_v36 }
 0x696   :  { %v4830_v11 = vpop.eup %4829  ;;  %4654 = vmatprep.subr.bf16.mxu1 %v4653_v39 }
 0x697   :  { %v1211_v12 = vmul.f32 %v4830_v11, %v4816_v42  ;;  %v4832_v15 = vpop.eup %4831  ;;  %4656 = vmatpush3.bf16.msra.mxu1 %v4653_v39 }
 0x698   :  { %v1214_v20 = vmul.f32 %v4832_v15, %v4814_v41 }
 0x699   :  { %4242 = vmatprep.mubr.msk.f32.mxu0 %vm1128_vm8, %v1211_v12 }
 0x69a   :  { %v4834_v16 = vpop.eup %4833  ;;  %4243 = vmatmul.mubr.msk.f32.gmra.mrb[26].mxu0 %vm1128_vm8, %v1212_v13 }
 0x69b   :  { %v1213_v17 = vmul.f32 %v4834_v16, %v4820_v46  ;;  %v4836_v19 = vpop.eup %4835 }
 0x69c   :  { %v1216_v23 = vmul.f32 %v4836_v19, %v4818_v45 }
 0x69d   :  { %4245 = vmatprep.mubr.msk.f32.mxu0 %vm1128_vm8, %v1213_v17 }
 0x69e   :  { %v4838_v21 = vpop.eup %4837  ;;  %4246 = vmatmul.mubr.msk.f32.gmra.mrb[28].mxu0 %vm1128_vm8, %v1214_v20 }
 0x69f   :  { %v1215_v22 = vmul.f32 %v4838_v21, %v4822_v49 }
 0x6a1   :  { %4248 = vmatprep.mubr.msk.f32.mxu0 %vm1128_vm8, %v1215_v22 }
 0x6a2   :  { %4249 = vmatmul.mubr.msk.f32.gmra.mrb[30].mxu0 %vm1128_vm8, %v1216_v23 }
 0x765   :  { %v4241_v25 = vpop.f32.mrb[24].mxu0 }
 0x766   :  { %v1307_v24 = vpop.f32.mrb[25].mxu0 }
 0x767   :  { %4253 = vmatprep.mubr.msk.f32.mxu0 %vm958_vm6, %v1307_v24  ;;  %v1811_v24 = vld [vmem:[%s5974_s17 + $0x8] sm:$0xff] }
 0x768   :  { %4254 = vmatmul.mubr.msk.f32.vlgmr.msra.gmra.mrb[32].mxu0 %vm958_vm6, %v4241_v25  ;;  %v1810_v25 = vld [vmem:[%s5974_s17] sm:$0xff] }
 0x76d   :  { %v4244_v26 = vpop.f32.mrb[26].mxu0 }
 0x76e   :  { %v1317_v27 = vpop.f32.mrb[27].mxu0 }
 0x76f   :  { %4256 = vmatprep.mubr.msk.f32.mxu0 %vm958_vm6, %v1317_v27  ;;  %v4661_v27 = vpack.c.bf16 %v1811_v24, %v1810_v25 }
 0x770   :  { %4257 = vmatmul.mubr.msk.f32.gmra.mrb[34].mxu0 %vm958_vm6, %v4244_v26  ;;  %v1812_v26 = vld [vmem:[%s5974_s17 + $0x10] sm:$0xff] }
 0x771   :  { %v4247_v28 = vpop.f32.mrb[28].mxu0  ;;  %4662 = vmatprep.subr.bf16.mxu1 %v4661_v27 }
 0x772   :  { %v1327_v29 = vpop.f32.mrb[29].mxu0 }
 0x773   :  { %4259 = vmatprep.mubr.msk.f32.mxu0 %vm958_vm6, %v1327_v29 }
 0x774   :  { %4260 = vmatmul.mubr.msk.f32.gmra.mrb[36].mxu0 %vm958_vm6, %v4247_v28  ;;  %v1813_v28 = vld [vmem:[%s5974_s17 + $0x18] sm:$0xff] }
 0x775   :  { %v4250_v30 = vpop.f32.mrb[30].mxu0  ;;  %v4665_v29 = vpack.c.bf16 %v1813_v28, %v1812_v26 }
 0x776   :  { %v1337_v31 = vpop.f32.mrb[31].mxu0 }
 0x777   :  { %4262 = vmatprep.mubr.msk.f32.mxu0 %vm958_vm6, %v1337_v31 }
 0x778   :  { %4263 = vmatmul.mubr.msk.f32.gmra.mrb[38].mxu0 %vm958_vm6, %v4250_v30 }
 0x779   :  { %4281 = vmatprep.mubr.msk.f32.mxu0 %vm1128_vm8, %v5431_v32 }
 0x83b   :  { %v4255_v40 = vpop.f32.mrb[32].mxu0 }
 0x83c   :  { %v1476_v41 = vmul.f32 %v4255_v40, %v5149_v60  ;;  %v1436_v42 = vpop.f32.mrb[33].mxu0 }
 0x83d   :  { %v1475_v43 = vmul.f32 %v1436_v42, %v5154_v61 }
 0x83f   :  { %v4633_v44 = vpack.c.bf16 %v1476_v41, %v1475_v43 }
 0x841   :  { %4634 = vmatprep.subr.bf16.mxu0 %v4633_v44 }
 0x842   :  { %4636 = vmatpush3.bf16.msra.mxu0 %v4633_v44 }
 0x843   :  { %v4258_v45 = vpop.f32.mrb[34].mxu0 }
 0x844   :  { %v1478_v46 = vmul.f32 %v4258_v45, %v5185_v3  ;;  %v1446_v47 = vpop.f32.mrb[35].mxu0 }
 0x845   :  { %v1477_v48 = vmul.f32 %v1446_v47, %v5163_v62  ;;  %v100_v62 = vld [vmem:[%s6018_s13 + $0x8] sm:$0xff] }
 0x847   :  { %v4637_v49 = vpack.c.bf16 %v1478_v46, %v1477_v48  ;;  %v4261_v50 = vpop.f32.mrb[36].mxu0  ;;  %v1693_v48 = vsub.s32 1, %v5109_v34 }
 0x848   :  { %v1480_v53 = vmul.f32 %v4261_v50, %v5202_v5  ;;  %v1456_v54 = vpop.f32.mrb[37].mxu0 }
 0x849   :  { %v1479_v55 = vmul.f32 %v1456_v54, %v5168_v63  ;;  %4638 = vmatprep.subr.bf16.mxu0 %v4637_v49  ;;  %v4890_v54 = vld [vmem:[%s5969_s12] sm:$0x7] }
 0x84a   :  { %4640 = vmatpush3.bf16.msra.mxu0 %v4637_v49  ;;  %v4889_v49 = vld [vmem:[%s6011_s30] sm:$0x7] }
 0x84b   :  { %v4641_v60 = vpack.c.bf16 %v1480_v53, %v1479_v55  ;;  %v4264_v61 = vpop.f32.mrb[38].mxu0  ;;  %v1694_v50 = vrot.slane %v4889_v49, %v1693_v48  ;;  %v1702_v55 = vrot.slane %v4890_v54, %v1693_v48 }
 0x84c   :  { %v1482_v56 = vmul.f32 %v4264_v61, %v5209_v6  ;;  %v1466_v57 = vpop.f32.mrb[39].mxu0 }
 0x84d   :  { %v1481_v58 = vmul.f32 %v1466_v57, %v5190_v4  ;;  %4642 = vmatprep.subr.bf16.mxu0 %v4641_v60  ;;  %v3727_v4 = vld [vmem:[%s5973_s16] ss:$0 sm:$0xff] }
 0x84e   :  { %4644 = vmatpush3.bf16.msra.mxu0 %v4641_v60 }
 0x84f   :  { %v4645_v3 = vpack.c.bf16 %v1482_v56, %v1481_v58 }
 0x851   :  { %4646 = vmatprep.subr.bf16.mxu0 %v4645_v3 }
 0x852   :  { %4648 = vmatpush3.bf16.msra.mxu0 %v4645_v3 }
 0x855   :  { %4282 = vmatmul.mubr.msk.f32.vlgmr.msra.gmra.mrb[40].mxu0 %vm1128_vm8, %v100_v62 }
 0x856   :  { %4299 = vmatprep.mubr.msk.f32.mxu0 %vm176_vm1, %v5093_v14  ;;  %v4888_v14 = vld [vmem:[%s6009_s8] sm:$0xff]  ;;  %s6019_s8 = sld [smem:[#allocation6_spill]] }
 0x85c   :  { %v1958_v62 = vld [vmem:[%s6019_s8] sm:$0xff] }
 0x928   :  { %v4283_v63 = vpop.f32.mrb[40].mxu0 }
 0x929   :  { %v1555_v5 = vpop.f32.mrb[41].mxu0 }
 0x92a   :  { %4292 = vmatprep.mubr.msk.f32.mxu1 %vm122_vm0, %v1555_v5 }
 0x92b   :  { %4293 = vmatmul.mubr.msk.f32.vlgmr.msra.gmra.mrb[24].mxu1 %vm122_vm0, %v4283_v63  ;;  %v1959_v63 = vld [vmem:[%s6019_s8 + $0x8] sm:$0xff]  ;;  %s6021_s8 = sld [smem:[#allocation13_spill]] }
 0x92c   :  { %4664 = vmatpush3.bf16.msra.mxu1 %v4661_v27 }
 0x92d   :  { %4666 = vmatprep.subr.bf16.mxu1 %v4665_v29 }
 0x930   :  { %4668 = vmatpush3.bf16.msra.mxu1 %v4665_v29 }
 0x931   :  { %v5583_v24 = vld [vmem:[%s6021_s8 + $0x8] sm:$0xff]  ;;  %v5588_v26 = vld [vmem:[%s6021_s8] sm:$0xff]  ;;  %v5597_v27 = vld [vmem:[%s6021_s8 + $0x10] sm:$0xff] }
 0x932   :  { %v5602_v28 = vld [vmem:[%s6021_s8 + $0x20] sm:$0xff]  ;;  %v5611_v29 = vld [vmem:[%s6021_s8 + $0x18] sm:$0xff] }
 0x9fe   :  { %v4294_v6 = vpop.f32.mrb[24].mxu1 }
 0x9ff   :  { %v1648_v59 = vadd.f32 %v4294_v6, %v3727_v4  ;;  %v1642_v0 = vpop.f32.mrb[25].mxu1  ;;  %v4669_v6 = vpack.c.bf16 %v1959_v63, %v1958_v62 }
 0xa00   :  { %v1643_v1 = vadd.f32 %v3727_v4, %v1642_v0  ;;  %v4892_v0 = vld [vmem:[%s6010_s0 + $0x10] sm:$0xff] }
 0xa01   :  { %v5469_v8 = vadd.f32 %v4887_v7, %v1648_v59  ;;  %v4891_v59 = vld [vmem:[%s6010_s0 + $0x8] sm:$0xff]  ;;  %v4894_v7 = vld [vmem:[%s6010_s0 + $0x20] sm:$0xff] }
 0xa02   :  { %v5474_v9 = vadd.f32 %v4888_v14, %v1643_v1  ;;  %v4893_v1 = vld [vmem:[%s6010_s0 + $0x18] sm:$0xff]  ;;  %v4895_v14 = vld [vmem:[%s6010_s0 + $0x28] sm:$0xff] }
 0xa03   :  { %v1656_v10 = vsel %vm122_vm0, %v5469_v8, 0.0 }
 0xa04   :  { %1657 = vadd.xlane.f32.xlu1 %v1656_v10  ;;  %v1653_v11 = vsel %vm122_vm0, %v5474_v9, 0.0  ;;  %v4896_v10 = vld [vmem:[%s6010_s0 + $0x30] sm:$0xff] }
 0xa05   :  { %1654 = vadd.xlane.f32.xlu0 %v1653_v11  ;;  %v1950_v11 = vld [vmem:[%s6020_s28] sm:$0xff] }
 0xa91   :  { %v1658_v12 = vpop.xlane.xlu1 %1657 }
 0xa92   :  { %v1660_v13 = vmul.f32 0.03125, %v1658_v12  ;;  %v1655_v15 = vpop.xlane.xlu0 %1654  ;;  %v4897_v12 = vld [vmem:[%s6010_s0 + $0x38] sm:$0xff]  ;;  %s4937_s0 = smov [#allocation2]  }
 0xa93   :  { %v1659_v16 = vmul.f32 0.03125, %v1655_v15  ;;  %v1952_v15 = vld [vmem:[%s6020_s28 + $0x10] sm:$0xff]  ;;  %s3641_s11 = sshll.u32 %s4937_s0, 4  ;;  %s3642_s11 = int_to_ptr.vmem [resolvable:$true] %s3641_s11 }
 0xa94   :  { %v1662_v17 = vsub.f32 %v5469_v8, %v1660_v13  ;;  %v1951_v13 = vld [vmem:[%s6020_s28 + $0x8] sm:$0xff]  ;;  %p4915_p1 = scmp.lt.s32.totalorder %s3642_s11, %s3642_s11 }
 0xa95   :  { %v1661_v19 = vsub.f32 %v5474_v9, %v1659_v16  ;;  %v1953_v16 = vld [vmem:[%s6020_s28 + $0x18] sm:$0xff] }
 0xa96   :  { %v1664_v20 = vmul.f32 %v1662_v17, %v1662_v17  ;;  %v1696_v53 = vmul.f32 %v1694_v50, %v1662_v17  ;;  %v1954_v17 = vld [vmem:[%s6020_s28 + $0x20] sm:$0xff] }
 0xa97   :  { %v1663_v21 = vmul.f32 %v1661_v19, %v1661_v19  ;;  %v1695_v61 = vmul.f32 %v1694_v50, %v1661_v19  ;;  %v1955_v19 = vld [vmem:[%s6020_s28 + $0x28] sm:$0xff] }
 0xa98   :  { %v1668_v22 = vsel %vm122_vm0, %v1664_v20, 0.0  ;;  %v1956_v20 = vld [vmem:[%s6020_s28 + $0x30] sm:$0xff] }
 0xa99   :  { %1669 = vadd.xlane.f32.xlu1 %v1668_v22  ;;  %v1665_v23 = vsel %vm122_vm0, %v1663_v21, 0.0  ;;  %v1957_v21 = vld [vmem:[%s6020_s28 + $0x38] sm:$0xff]  ;;  %v2089_v22 = vld [vmem:[%s5976_s19] sm:$0xff] }
 0xa9a   :  { %1666 = vadd.xlane.f32.xlu0 %v1665_v23  ;;  %v2090_v23 = vld [vmem:[%s5976_s19 + $0x8] sm:$0xff] }
 0xa9b   :  { %v4673_v25 = vpack.c.bf16 %v2090_v23, %v2089_v22 }
 0xa9d   :  { %4674 = vmatprep.subr.bf16.mxu1 %v4673_v25 }
 0xaaa   :  { %2526 = vrot.lane.b32.xlu1 %v5583_v24, %s4934_s2 }
 0xaae   :  { %2528 = vrot.lane.b32.xlu1 %v5597_v27, %s4934_s2 }
 0xab0   :  { %2524 = vrot.lane.b32.xlu0 %v5588_v26, %s4934_s2 }
 0xab2   :  { %2530 = vrot.lane.b32.xlu1 %v5611_v29, %s4934_s2 }
 0xab4   :  { %2532 = vrot.lane.b32.xlu0 %v5602_v28, %s4934_s2 }
 0xb26   :  { %v1670_v30 = vpop.xlane.xlu1 %1669 }
 0xb27   :  { %v1672_v31 = vmul.f32 0.032258064, %v1670_v30  ;;  %v1667_v33 = vpop.xlane.xlu0 %1666  ;;  %v5616_v30 = vld [vmem:[%s6021_s8 + $0x30] sm:$0xff] }
 0xb28   :  { %v1671_v35 = vmul.f32 0.032258064, %v1667_v33  ;;  %2536 = vrot.lane.b32.xlu0 %v5616_v30, %s4934_s2  ;;  %v5632_v33 = vld [vmem:[%s6021_s8 + $0x38] sm:$0xff] }
 0xb29   :  { %4839 = vrsqrt.f32 %v1672_v31  ;;  %vm1682_vm9 = vcmp.eq.f32.partialorder %v1672_v31, inf  ;;  %v1685_v39 = vand.u32 2147483648, %v1672_v31  ;;  %vm1684_vm10 = vcmp.eq.f32.partialorder %v1672_v31, 0.0 }
 0xb2a   :  { %4841 = vrsqrt.f32 %v1671_v35  ;;  %vm1675_vm11 = vcmp.eq.f32.partialorder %v1671_v35, inf  ;;  %v1678_v42 = vand.u32 2147483648, %v1671_v35  ;;  %vm1677_vm12 = vcmp.eq.f32.partialorder %v1671_v35, 0.0 }
 0xb33   :  { %v4840_v36 = vpop.eup %4839 }
 0xb34   :  { %v4842_v37 = vpop.eup %4841  ;;  %v1681_v38 = vmul.f32 %v4840_v36, %v1672_v31  ;;  %v2092_v36 = vld [vmem:[%s5976_s19 + $0x18] sm:$0xff] }
 0xb35   :  { %v1674_v40 = vmul.f32 %v4842_v37, %v1671_v35 }
 0xb36   :  { %v1683_v41 = vsel %vm1682_vm9, %v1672_v31, %v1681_v38  ;;  %v5625_v31 = vld [vmem:[%s6021_s8 + $0x28] sm:$0xff] }
 0xb37   :  { %v1676_v43 = vsel %vm1675_vm11, %v1671_v35, %v1674_v40  ;;  %v1686_v44 = vsel %vm1684_vm10, %v1685_v39, %v1683_v41  ;;  %2534 = vrot.lane.b32.xlu1 %v5625_v31, %s4934_s2  ;;  %v2091_v35 = vld [vmem:[%s5976_s19 + $0x10] sm:$0xff] }
 0xb38   :  { %v1679_v45 = vsel %vm1677_vm12, %v1678_v42, %v1676_v43  ;;  %v1688_v46 = vadd.f32 1e-06, %v1686_v44  ;;  %v4677_v39 = vpack.c.bf16 %v2092_v36, %v2091_v35  ;;  %v3755_v35 = vld [vmem:[%s5977_s20] ss:$0 sm:$0xff] }
 0xb39   :  { %v1687_v47 = vadd.f32 1e-06, %v1679_v45 }
 0xb3a   :  { %4843 = vrcp.f32 %v1688_v46 }
 0xb3b   :  { %4845 = vrcp.f32 %v1687_v47  ;;  %2538 = vrot.lane.b32.xlu1 %v5632_v33, %s4934_s2 }
 0xb44   :  { %v4844_v60 = vpop.eup %4843 }
 0xb45   :  { %v4846_v56 = vpop.eup %4845  ;;  %v1698_v57 = vmul.f32 %v4844_v60, %v1696_v53  ;;  %v3738_v60 = vld [vmem:[%s5975_s18] ss:$0 sm:$0xff] }
 0xb46   :  { %v1697_v58 = vmul.f32 %v4846_v56, %v1695_v61 }
 0xb47   :  { %v1704_v3 = vadd.f32 %v1702_v55, %v1698_v57 }
 0xb48   :  { %v1703_v5 = vadd.f32 %v1702_v55, %v1697_v58 }
 0xb4a   :  { %v4657_v4 = vpack.c.bf16 %v1704_v3, %v1703_v5  ;;  %v5668_v3 = vld [vmem:[%s6012_s1] sm:$0xff]  ;;  %v5674_v5 = vld [vmem:[%s6012_s1 + $0x8] sm:$0xff] }
 0xb4c   :  { %4658 = vmatprep.subr.bf16.mxu0 %v4657_v4 }
 0xb4d   :  { %4660 = vmatpush3.bf16.msra.mxu0 %v4657_v4 }
 0xb4e   :  { %4670 = vmatprep.subr.bf16.mxu0 %v4669_v6 }
 0xb50   :  { %4300 = vmatmul.mubr.msk.f32.vlgmr.msra.gmra.mrb[42].mxu0 %vm176_vm1, %v4891_v59 }
 0xb51   :  { %4672 = vmatpush3.bf16.msra.mxu0 %v4669_v6  ;;  %4302 = vmatprep.mubr.msk.f32.mxu0 %vm176_vm1, %v4892_v0 }
 0xb52   :  { %4682 = vmatprep.subr.bf16.mxu0 %v5176_v2 }
 0xb54   :  { %4303 = vmatmul.mubr.msk.f32.gmra.mrb[44].mxu0 %vm176_vm1, %v4893_v1  ;;  %v5682_v1 = vld [vmem:[%s6012_s1 + $0x10] sm:$0xff] }
 0xb55   :  { %4305 = vmatprep.mubr.msk.f32.mxu0 %vm176_vm1, %v4894_v7 }
 0xb58   :  { %4306 = vmatmul.mubr.msk.f32.gmra.mrb[46].mxu0 %vm176_vm1, %v4895_v14 }
 0xb59   :  { %4308 = vmatprep.mubr.msk.f32.mxu0 %vm176_vm1, %v4896_v10  ;;  %v2527_v10 = vpop.permute.xlu1 %2526 }
 0xb5c   :  { %4309 = vmatmul.mubr.msk.f32.gmra.mrb[48].mxu0 %vm176_vm1, %v4897_v12 }
 0xb5d   :  { %4335 = vmatprep.mubr.msk.f32.mxu0 %vm176_vm1, %v1950_v11  ;;  %v5689_v11 = vld [vmem:[%s6012_s1 + $0x18] sm:$0xff]  ;;  %v2529_v36 = vpop.permute.xlu1 %2528 }
 0xb60   :  { %4336 = vmatmul.mubr.msk.f32.vlgmr.msra.gmra.mrb[50].mxu0 %vm176_vm1, %v1951_v13 }
 0xb61   :  { %4338 = vmatprep.mubr.msk.f32.mxu0 %vm176_vm1, %v1952_v15  ;;  %4684 = vmatpush3.bf16.msra.mxu0 %v5176_v2 }
 0xb62   :  { %4686 = vmatprep.subr.bf16.mxu0 %v5228_v18 }
 0xb64   :  { %4339 = vmatmul.mubr.msk.f32.gmra.mrb[52].mxu0 %vm176_vm1, %v1953_v16 }
 0xb65   :  { %4341 = vmatprep.mubr.msk.f32.mxu0 %vm176_vm1, %v1954_v17  ;;  %4688 = vmatpush3.bf16.msra.mxu0 %v5228_v18 }
 0xb66   :  { %4698 = vmatprep.subr.bf16.mxu0 %v5176_v2 }
 0xb68   :  { %4342 = vmatmul.mubr.msk.f32.gmra.mrb[54].mxu0 %vm176_vm1, %v1955_v19 }
 0xb69   :  { %4344 = vmatprep.mubr.msk.f32.mxu0 %vm176_vm1, %v1956_v20  ;;  %v5705_v20 = vld [vmem:[%s6012_s1 + $0x28] sm:$0xff] }
 0xb6c   :  { %4345 = vmatmul.mubr.msk.f32.gmra.mrb[56].mxu0 %vm176_vm1, %v1957_v21 }
 0xc23   :  { %v4301_v37 = vpop.f32.mrb[42].mxu0 }
 0xc24   :  { %v1771_v38 = vpop.f32.mrb[43].mxu0 }
 0xc25   :  { %4319 = vmatprep.mubr.msk.f32.mxu1 %vm122_vm0, %v1771_v38 }
 0xc26   :  { %4320 = vmatmul.mubr.msk.f32.vlgmr.msra.gmra.mrb[26].mxu1 %vm122_vm0, %v4301_v37 }
 0xc27   :  { %v4304_v40 = vpop.f32.mrb[44].mxu0  ;;  %4676 = vmatpush3.bf16.msra.mxu1 %v4673_v25 }
 0xc28   :  { %v1781_v41 = vpop.f32.mrb[45].mxu0  ;;  %4678 = vmatprep.subr.bf16.mxu1 %v4677_v39 }
 0xc29   :  { %4322 = vmatprep.mubr.msk.f32.mxu1 %vm122_vm0, %v1781_v41 }
 0xc2a   :  { %4323 = vmatmul.mubr.msk.f32.gmra.mrb[28].mxu1 %vm122_vm0, %v4304_v40 }
 0xc2b   :  { %v4307_v42 = vpop.f32.mrb[46].mxu0  ;;  %4680 = vmatpush3.bf16.msra.mxu1 %v4677_v39  ;;  %v5722_v39 = vld [vmem:[%s6012_s1 + $0x38] sm:$0xff] }
 0xc2c   :  { %v1791_v43 = vpop.f32.mrb[47].mxu0  ;;  %4690 = vmatprep.subr.bf16.mxu1 %v5176_v2 }
 0xc2d   :  { %4325 = vmatprep.mubr.msk.f32.mxu1 %vm122_vm0, %v1791_v43  ;;  %v2525_v43 = vpop.permute.xlu0 %2524 }
 0xc2e   :  { %4326 = vmatmul.mubr.msk.f32.gmra.mrb[30].mxu1 %vm122_vm0, %v4307_v42 }
 0xc2f   :  { %v4310_v44 = vpop.f32.mrb[48].mxu0 }
 0xc30   :  { %v1801_v45 = vpop.f32.mrb[49].mxu0 }
 0xc31   :  { %4328 = vmatprep.mubr.msk.f32.mxu1 %vm122_vm0, %v1801_v45 }
 0xc32   :  { %4329 = vmatmul.mubr.msk.f32.gmra.mrb[32].mxu1 %vm122_vm0, %v4310_v44 }
 0xc33   :  { %v4337_v46 = vpop.f32.mrb[50].mxu0 }
 0xc34   :  { %v2050_v47 = vpop.f32.mrb[51].mxu0 }
 0xc35   :  { %4355 = vmatprep.mubr.msk.f32.mxu1 %vm122_vm0, %v2050_v47 }
 0xc36   :  { %4356 = vmatmul.mubr.msk.f32.vlgmr.msra.gmra.mrb[34].mxu1 %vm122_vm0, %v4337_v46 }
 0xc37   :  { %v4340_v48 = vpop.f32.mrb[52].mxu0  ;;  %4692 = vmatpush3.bf16.msra.mxu1 %v5176_v2 }
 0xc38   :  { %v2060_v49 = vpop.f32.mrb[53].mxu0  ;;  %4694 = vmatprep.subr.bf16.mxu1 %v5228_v18 }
 0xc39   :  { %4358 = vmatprep.mubr.msk.f32.mxu1 %vm122_vm0, %v2060_v49  ;;  %v2531_v49 = vpop.permute.xlu1 %2530 }
 0xc3a   :  { %4359 = vmatmul.mubr.msk.f32.gmra.mrb[36].mxu1 %vm122_vm0, %v4340_v48 }
 0xc3b   :  { %v4343_v50 = vpop.f32.mrb[54].mxu0  ;;  %4696 = vmatpush3.bf16.msra.mxu1 %v5228_v18 }
 0xc3c   :  { %v2070_v53 = vpop.f32.mrb[55].mxu0 }
 0xc3d   :  { %4361 = vmatprep.mubr.msk.f32.mxu1 %vm122_vm0, %v2070_v53 }
 0xc3e   :  { %4362 = vmatmul.mubr.msk.f32.gmra.mrb[38].mxu1 %vm122_vm0, %v4343_v50 }
 0xc3f   :  { %v4346_v54 = vpop.f32.mrb[56].mxu0 }
 0xc40   :  { %v2080_v55 = vpop.f32.mrb[57].mxu0 }
 0xc41   :  { %4364 = vmatprep.mubr.msk.f32.mxu1 %vm122_vm0, %v2080_v55 }
 0xc42   :  { %4365 = vmatmul.mubr.msk.f32.gmra.mrb[40].mxu1 %vm122_vm0, %v4346_v54 }
 0xcf9   :  { %v4321_v61 = vpop.f32.mrb[26].mxu1 }
 0xcfa   :  { %v1917_v56 = vadd.f32 %v4321_v61, %v3738_v60  ;;  %v1911_v57 = vpop.f32.mrb[27].mxu1 }
 0xcfb   :  { %v1912_v58 = vadd.f32 %v3738_v60, %v1911_v57 }
 0xcfc   :  { %v2243_v4 = vmul.f32 %v5674_v5, %v1917_v56 }
 0xcfd   :  { %v2242_v62 = vmul.f32 %v5668_v3, %v1912_v58  ;;  %v4324_v63 = vpop.f32.mrb[28].mxu1  ;;  %v2535_v58 = vpop.permute.xlu1 %2534 }
 0xcfe   :  { %v1927_v6 = vadd.f32 %v4324_v63, %v3738_v60  ;;  %v1921_v59 = vpop.f32.mrb[29].mxu1  ;;  %v2533_v63 = vpop.permute.xlu0 %2532 }
 0xcff   :  { %v1922_v0 = vadd.f32 %v3738_v60, %v1921_v59  ;;  %4375 = vmatprep.mubr.msk.f32.mxu0 %vm122_vm0, %v2242_v62 }
 0xd00   :  { %4376 = vmatmul.mubr.msk.f32.vlgmr.msra.gmra.mrb[58].mxu0 %vm122_vm0, %v2243_v4  ;;  %v2245_v12 = vmul.f32 %v5689_v11, %v1927_v6 }
 0xd01   :  { %v2244_v7 = vmul.f32 %v5682_v1, %v1922_v0  ;;  %v4327_v14 = vpop.f32.mrb[30].mxu1  ;;  %4700 = vmatpush3.bf16.msra.mxu0 %v5176_v2  ;;  %v5698_v2 = vld [vmem:[%s6012_s1 + $0x20] sm:$0xff] }
 0xd02   :  { %v1937_v13 = vadd.f32 %v4327_v14, %v3738_v60  ;;  %v1931_v15 = vpop.f32.mrb[31].mxu1  ;;  %4702 = vmatprep.subr.bf16.mxu0 %v5228_v18 }
 0xd03   :  { %v1932_v16 = vadd.f32 %v3738_v60, %v1931_v15  ;;  %4378 = vmatprep.mubr.msk.f32.mxu0 %vm122_vm0, %v2244_v7  ;;  %v2539_v7 = vpop.permute.xlu1 %2538 }
 0xd04   :  { %4379 = vmatmul.mubr.msk.f32.gmra.mrb[60].mxu0 %vm122_vm0, %v2245_v12  ;;  %v2247_v21 = vmul.f32 %v5705_v20, %v1937_v13  ;;  %v2537_v12 = vpop.permute.xlu0 %2536 }
 0xd05   :  { %v2246_v17 = vmul.f32 %v5698_v2, %v1932_v16  ;;  %v4330_v19 = vpop.f32.mrb[32].mxu1  ;;  %4704 = vmatpush3.bf16.msra.mxu0 %v5228_v18  ;;  %v5716_v18 = vld [vmem:[%s6012_s1 + $0x30] sm:$0xff] }
 0xd06   :  { %v1947_v22 = vadd.f32 %v4330_v19, %v3738_v60  ;;  %v1941_v23 = vpop.f32.mrb[33].mxu1 }
 0xd07   :  { %v1942_v25 = vadd.f32 %v3738_v60, %v1941_v23  ;;  %4381 = vmatprep.mubr.msk.f32.mxu0 %vm122_vm0, %v2246_v17 }
 0xd08   :  { %4382 = vmatmul.mubr.msk.f32.gmra.mrb[62].mxu0 %vm122_vm0, %v2247_v21  ;;  %v2249_v40 = vmul.f32 %v5722_v39, %v1947_v22 }
 0xd09   :  { %v2248_v37 = vmul.f32 %v5716_v18, %v1942_v25  ;;  %v4357_v38 = vpop.f32.mrb[34].mxu1 }
 0xd0a   :  { %v2196_v41 = vadd.f32 %v4357_v38, %v3755_v35  ;;  %v2190_v42 = vpop.f32.mrb[35].mxu1 }
 0xd0b   :  { %v2191_v44 = vadd.f32 %v3755_v35, %v2190_v42  ;;  %4384 = vmatprep.mubr.msk.f32.mxu0 %vm122_vm0, %v2248_v37 }
 0xd0c   :  { %v2549_v45 = vmul.f32 %v2527_v10, %v2196_v41  ;;  %4385 = vmatmul.mubr.msk.f32.gmra.mrb[64].mxu0 %vm122_vm0, %v2249_v40  ;;  %v2380_v50 = vmul.f32 %v2196_v41, %v5583_v24 }
 0xd0d   :  { %v2379_v46 = vmul.f32 %v2191_v44, %v5588_v26  ;;  %v2548_v47 = vmul.f32 %v2525_v43, %v2191_v44  ;;  %v4360_v48 = vpop.f32.mrb[36].mxu1 }
 0xd0e   :  { %v2206_v53 = vadd.f32 %v4360_v48, %v3755_v35  ;;  %2566 = vrot.lane.b32.xlu1 %v2549_v45, %s4935_s14  ;;  %v2200_v54 = vpop.f32.mrb[37].mxu1 }
 0xd0f   :  { %v2201_v55 = vadd.f32 %v3755_v35, %v2200_v54  ;;  %4395 = vmatprep.mubr.msk.f32.mxu1 %vm122_vm0, %v2379_v46  ;;  %2564 = vrot.lane.b32.xlu0 %v2548_v47, %s4935_s14 }
 0xd10   :  { %v2382_v60 = vmul.f32 %v2206_v53, %v5611_v29  ;;  %4396 = vmatmul.mubr.msk.f32.vlgmr.msra.gmra.mrb[42].mxu1 %vm122_vm0, %v2380_v50  ;;  %v2551_v61 = vmul.f32 %v2531_v49, %v2206_v53 }
 0xd11   :  { %v2381_v26 = vmul.f32 %v2201_v55, %v5597_v27  ;;  %v2550_v56 = vmul.f32 %v2529_v36, %v2201_v55  ;;  %v4363_v57 = vpop.f32.mrb[38].mxu1 }
 0xd12   :  { %v2216_v24 = vadd.f32 %v4363_v57, %v3755_v35  ;;  %2570 = vrot.lane.b32.xlu1 %v2551_v61, %s4935_s14  ;;  %v2210_v62 = vpop.f32.mrb[39].mxu1 }
 0xd13   :  { %4398 = vmatprep.mubr.msk.f32.mxu1 %vm122_vm0, %v2381_v26  ;;  %2568 = vrot.lane.b32.xlu0 %v2550_v56, %s4935_s14  ;;  %v2211_v4 = vadd.f32 %v3755_v35, %v2210_v62 }
 0xd14   :  { %v2384_v29 = vmul.f32 %v2216_v24, %v5625_v31  ;;  %4399 = vmatmul.mubr.msk.f32.gmra.mrb[44].mxu1 %vm122_vm0, %v2382_v60  ;;  %v2553_v6 = vmul.f32 %v2535_v58, %v2216_v24 }
 0xd15   :  { %v2383_v27 = vmul.f32 %v2211_v4, %v5602_v28  ;;  %v2552_v59 = vmul.f32 %v2533_v63, %v2211_v4  ;;  %v4366_v0 = vpop.f32.mrb[40].mxu1 }
 0xd16   :  { %2574 = vrot.lane.b32.xlu1 %v2553_v6, %s4935_s14  ;;  %v2226_v14 = vadd.f32 %v4366_v0, %v3755_v35  ;;  %v2220_v10 = vpop.f32.mrb[41].mxu1 }
 0xd17   :  { %2572 = vrot.lane.b32.xlu0 %v2552_v59, %s4935_s14  ;;  %4401 = vmatprep.mubr.msk.f32.mxu1 %vm122_vm0, %v2383_v27  ;;  %v2221_v13 = vadd.f32 %v3755_v35, %v2220_v10 }
 0xd18   :  { %v2386_v31 = vmul.f32 %v2226_v14, %v5632_v33  ;;  %4402 = vmatmul.mubr.msk.f32.gmra.mrb[46].mxu1 %vm122_vm0, %v2384_v29  ;;  %v2555_v15 = vmul.f32 %v2539_v7, %v2226_v14 }
 0xd19   :  { %v2385_v28 = vmul.f32 %v2221_v13, %v5616_v30  ;;  %v2554_v16 = vmul.f32 %v2537_v12, %v2221_v13 }
 0xd1a   :  { %2578 = vrot.lane.b32.xlu1 %v2555_v15, %s4935_s14 }
 0xd1b   :  { %2576 = vrot.lane.b32.xlu0 %v2554_v16, %s4935_s14  ;;  %4404 = vmatprep.mubr.msk.f32.mxu1 %vm122_vm0, %v2385_v28  ;;  %s6022_s14 = sld [smem:[#allocation8_spill]] }
 0xd1c   :  { %4405 = vmatmul.mubr.msk.f32.gmra.mrb[48].mxu1 %vm122_vm0, %v2386_v31 }
 0xd21   :  { %v2230_v59 = vld [vmem:[%s6022_s14 + $0x8] sm:$0xff]  ;;  %v2229_v14 = vld [vmem:[%s6022_s14] sm:$0xff]  ;;  %v2232_v15 = vld [vmem:[%s6022_s14 + $0x18] sm:$0xff] }
 0xd80   :  { %v2567_v17 = vpop.permute.xlu1 %2566 }
 0xd81   :  { %v2565_v19 = vpop.permute.xlu0 %2564 }
 0xd82   :  { %4415 = vmatprep.mubr.msk.f32.mxu0 %vm122_vm0, %v2565_v19 }
 0xd83   :  { %4416 = vmatmul.mubr.msk.f32.vlgmr.msra.gmra.mrb[66].mxu0 %vm122_vm0, %v2567_v17 }
 0xd84   :  { %v2571_v33 = vpop.permute.xlu1 %2570 }
 0xd85   :  { %v2569_v21 = vpop.permute.xlu0 %2568 }
 0xd86   :  { %4418 = vmatprep.mubr.msk.f32.mxu0 %vm122_vm0, %v2569_v21  ;;  %v2231_v21 = vld [vmem:[%s6022_s14 + $0x10] sm:$0xff] }
 0xd87   :  { %4419 = vmatmul.mubr.msk.f32.gmra.mrb[68].mxu0 %vm122_vm0, %v2571_v33 }
 0xd88   :  { %v2575_v30 = vpop.permute.xlu1 %2574 }
 0xd89   :  { %v2573_v22 = vpop.permute.xlu0 %2572 }
 0xd8a   :  { %4421 = vmatprep.mubr.msk.f32.mxu0 %vm122_vm0, %v2573_v22  ;;  %v2234_v22 = vld [vmem:[%s6022_s14 + $0x28] sm:$0xff] }
 0xd8b   :  { %4422 = vmatmul.mubr.msk.f32.gmra.mrb[70].mxu0 %vm122_vm0, %v2575_v30 }
 0xd8c   :  { %v2579_v23 = vpop.permute.xlu1 %2578 }
 0xd8d   :  { %v2577_v25 = vpop.permute.xlu0 %2576 }
 0xd8e   :  { %4424 = vmatprep.mubr.msk.f32.mxu0 %vm122_vm0, %v2577_v25 }
 0xd8f   :  { %4425 = vmatmul.mubr.msk.f32.gmra.mrb[72].mxu0 %vm122_vm0, %v2579_v23 }
 0xdd3   :  { %v4377_v35 = vpop.f32.mrb[58].mxu0 }
 0xdd4   :  { %v2340_v36 = vpop.f32.mrb[59].mxu0 }
 0xdd5   :  { %4443 = vmatprep.mubr.msk.f32.mxu1 %vm958_vm6, %v2340_v36 }
 0xdd7   :  { %v4380_v37 = vpop.f32.mrb[60].mxu0 }
 0xdd8   :  { %v2350_v38 = vpop.f32.mrb[61].mxu0 }
 0xddb   :  { %v4383_v40 = vpop.f32.mrb[62].mxu0 }
 0xddc   :  { %v2360_v41 = vpop.f32.mrb[63].mxu0 }
 0xddf   :  { %v4386_v42 = vpop.f32.mrb[64].mxu0 }
 0xde0   :  { %v2370_v43 = vpop.f32.mrb[65].mxu0 }
 0xde3   :  { %v4397_v44 = vpop.f32.mrb[42].mxu1 }
 0xde4   :  { %v2477_v45 = vpop.f32.mrb[43].mxu1 }
 0xde5   :  { %v4705_v46 = vpack.c.bf16 %v4397_v44, %v2477_v45 }
 0xde7   :  { %v4400_v47 = vpop.f32.mrb[44].mxu1  ;;  %4707 = vmatprep.subr.msk.bf16.mxu1 %vm5338_vm7, %v4705_v46 }
 0xde8   :  { %v2487_v48 = vpop.f32.mrb[45].mxu1  ;;  %4710 = vmatpush3.bf16.xpose.msk.msra.mxu1 %vm5338_vm7, %v4705_v46 }
 0xde9   :  { %v4711_v49 = vpack.c.bf16 %v4400_v47, %v2487_v48 }
 0xdeb   :  { %4713 = vmatprep.subr.msk.bf16.mxu1 %vm5338_vm7, %v4711_v49  ;;  %v4403_v50 = vpop.f32.mrb[46].mxu1 }
 0xdec   :  { %v2497_v53 = vpop.f32.mrb[47].mxu1 }
 0xded   :  { %v4717_v54 = vpack.c.bf16 %v4403_v50, %v2497_v53  ;;  %v2235_v50 = vld [vmem:[%s6022_s14 + $0x30] sm:$0xff] }
 0xdef   :  { %v4406_v55 = vpop.f32.mrb[48].mxu1 }
 0xdf0   :  { %4716 = vmatpush3.bf16.xpose.msk.msra.mxu1 %vm5338_vm7, %v4711_v49  ;;  %v2507_v60 = vpop.f32.mrb[49].mxu1 }
 0xdf1   :  { %4719 = vmatprep.subr.msk.bf16.mxu1 %vm5338_vm7, %v4717_v54  ;;  %v4723_v61 = vpack.c.bf16 %v4406_v55, %v2507_v60 }
 0xdf8   :  { %4722 = vmatpush3.bf16.xpose.msk.msra.mxu1 %vm5338_vm7, %v4717_v54 }
 0xdf9   :  { %4725 = vmatprep.subr.msk.bf16.mxu1 %vm5338_vm7, %v4723_v61 }
 0xe00   :  { %4728 = vmatpush3.bf16.xpose.msk.msra.mxu1 %vm5338_vm7, %v4723_v61 }
 0xe07   :  { %4444 = vmatmul.mubr.msk.f32.vlgmr.msra.gmra.mrb[50].mxu1 %vm958_vm6, %v4377_v35 }
 0xe08   :  { %4446 = vmatprep.mubr.msk.f32.mxu1 %vm958_vm6, %v2350_v38 }
 0xe0b   :  { %4447 = vmatmul.mubr.msk.f32.gmra.mrb[52].mxu1 %vm958_vm6, %v4380_v37 }
 0xe0c   :  { %4449 = vmatprep.mubr.msk.f32.mxu1 %vm958_vm6, %v2360_v41 }
 0xe0f   :  { %4450 = vmatmul.mubr.msk.f32.gmra.mrb[54].mxu1 %vm958_vm6, %v4383_v40  ;;  %v2233_v40 = vld [vmem:[%s6022_s14 + $0x20] sm:$0xff] }
 0xe10   :  { %4452 = vmatprep.mubr.msk.f32.mxu1 %vm958_vm6, %v2370_v43 }
 0xe13   :  { %4453 = vmatmul.mubr.msk.f32.gmra.mrb[56].mxu1 %vm958_vm6, %v4386_v42  ;;  %v2236_v42 = vld [vmem:[%s6022_s14 + $0x38] sm:$0xff] }
 0xe14   :  { %4513 = vmatprep.mubr.msk.f32.mxu1 %vm1128_vm8, %v5431_v32 }
 0xe56   :  { %v4417_v26 = vpop.f32.mrb[66].mxu0 }
 0xe57   :  { %v2662_v51 = vpop.f32.mrb[67].mxu0 }
 0xe58   :  { %v4729_v56 = vpack.c.bf16 %v4417_v26, %v2662_v51 }
 0xe5a   :  { %v4420_v57 = vpop.f32.mrb[68].mxu0  ;;  %4730 = vmatprep.subr.bf16.mxu0 %v4729_v56 }
 0xe5b   :  { %v2672_v58 = vpop.f32.mrb[69].mxu0  ;;  %4732 = vmatpush3.bf16.msra.mxu0 %v4729_v56 }
 0xe5c   :  { %v4733_v24 = vpack.c.bf16 %v4420_v57, %v2672_v58 }
 0xe5e   :  { %4734 = vmatprep.subr.bf16.mxu0 %v4733_v24  ;;  %v4423_v62 = vpop.f32.mrb[70].mxu0 }
 0xe5f   :  { %4736 = vmatpush3.bf16.msra.mxu0 %v4733_v24  ;;  %v2682_v63 = vpop.f32.mrb[71].mxu0 }
 0xe60   :  { %v4737_v4 = vpack.c.bf16 %v4423_v62, %v2682_v63 }
 0xe62   :  { %4738 = vmatprep.subr.bf16.mxu0 %v4737_v4  ;;  %v4426_v29 = vpop.f32.mrb[72].mxu0 }
 0xe63   :  { %4740 = vmatpush3.bf16.msra.mxu0 %v4737_v4  ;;  %v2692_v6 = vpop.f32.mrb[73].mxu0 }
 0xe64   :  { %v4741_v27 = vpack.c.bf16 %v4426_v29, %v2692_v6 }
 0xe66   :  { %4742 = vmatprep.subr.bf16.mxu0 %v4741_v27 }
 0xe67   :  { %4744 = vmatpush3.bf16.msra.mxu0 %v4741_v27 }
 0xe68   :  { %4483 = vmatprep.subr.mxu0 %v5408_v52 }
 0xeda   :  { %v4445_v32 = vpop.f32.mrb[50].mxu1 }
 0xedb   :  { %v2855_v0 = vmul.f32 0.35355338, %v4445_v32  ;;  %v2815_v7 = vpop.f32.mrb[51].mxu1 }
 0xedc   :  { %v2854_v10 = vmul.f32 0.35355338, %v2815_v7 }
 0xedd   :  { %v2863_v12 = vadd.f32 %v2855_v0, %v2230_v59 }
 0xede   :  { %v4448_v13 = vpop.f32.mrb[52].mxu1  ;;  %v2862_v31 = vadd.f32 %v2854_v10, %v2229_v14 }
 0xedf   :  { %v2857_v52 = vmul.f32 0.35355338, %v4448_v13  ;;  %v2825_v28 = vpop.f32.mrb[53].mxu1  ;;  %v2873_v16 = vsel %vm1128_vm8, %v2863_v12, -inf }
 0xee0   :  { %v2856_v17 = vmul.f32 0.35355338, %v2825_v28  ;;  %2874 = vmax.xlane.f32.xlu1 %v2873_v16  ;;  %v2870_v19 = vsel %vm1128_vm8, %v2862_v31, -inf }
 0xee1   :  { %2871 = vmax.xlane.f32.xlu0 %v2870_v19  ;;  %v2865_v33 = vadd.f32 %v2857_v52, %v2232_v15 }
 0xee2   :  { %v4451_v30 = vpop.f32.mrb[54].mxu1  ;;  %v2864_v37 = vadd.f32 %v2856_v17, %v2231_v21 }
 0xee3   :  { %v2859_v23 = vmul.f32 0.35355338, %v4451_v30  ;;  %v2835_v25 = vpop.f32.mrb[55].mxu1  ;;  %v2879_v35 = vsel %vm1128_vm8, %v2865_v33, -inf }
 0xee4   :  { %v2858_v36 = vmul.f32 0.35355338, %v2835_v25  ;;  %v2876_v47 = vsel %vm1128_vm8, %v2864_v37, -inf }
 0xee5   :  { %2880 = vmax.xlane.f32.xlu0 %v2879_v35  ;;  %v2867_v38 = vadd.f32 %v2859_v23, %v2234_v22 }
 0xee6   :  { %v4454_v41 = vpop.f32.mrb[56].mxu1  ;;  %v2866_v48 = vadd.f32 %v2858_v36, %v2233_v40 }
 0xee7   :  { %v2861_v43 = vmul.f32 0.35355338, %v4454_v41  ;;  %v2845_v44 = vpop.f32.mrb[57].mxu1  ;;  %v2885_v45 = vsel %vm1128_vm8, %v2867_v38, -inf }
 0xee8   :  { %v2860_v46 = vmul.f32 0.35355338, %v2845_v44  ;;  %2886 = vmax.xlane.f32.xlu1 %v2885_v45  ;;  %v2882_v54 = vsel %vm1128_vm8, %v2866_v48, -inf }
 0xee9   :  { %2877 = vmax.xlane.f32.xlu0 %v2876_v47  ;;  %v2869_v49 = vadd.f32 %v2861_v43, %v2236_v42 }
 0xeea   :  { %v2868_v55 = vadd.f32 %v2860_v46, %v2235_v50 }
 0xeeb   :  { %v2891_v53 = vsel %vm1128_vm8, %v2869_v49, -inf }
 0xeec   :  { %2892 = vmax.xlane.f32.xlu1 %v2891_v53  ;;  %v2888_v60 = vsel %vm1128_vm8, %v2868_v55, -inf }
 0xeed   :  { %2883 = vmax.xlane.f32.xlu0 %v2882_v54 }
 0xef1   :  { %2889 = vmax.xlane.f32.xlu0 %v2888_v60  ;;  %v4906_v60 = vld [vmem:[%s6017_s3] sm:$0xff] }
 0xf6d   :  { %v2875_v61 = vpop.xlane.xlu1 %2874 }
 0xf6e   :  { %v2895_v26 = vsub.f32 %v2863_v12, %v2875_v61  ;;  %v2872_v51 = vpop.xlane.xlu0 %2871 }
 0xf6f   :  { %v2894_v56 = vsub.f32 %v2862_v31, %v2872_v51 }
 0xf70   :  { %v2904_v57 = vmul.f32 1.442695, %v2895_v26 }
 0xf71   :  { %v2902_v58 = vmul.f32 1.442695, %v2894_v56 }
 0xf72   :  { %4847 = vpow2.f32 %v2904_v57  ;;  %v2881_v24 = vpop.xlane.xlu0 %2880 }
 0xf73   :  { %4849 = vpow2.f32 %v2902_v58  ;;  %v2897_v62 = vsub.f32 %v2865_v33, %v2881_v24 }
 0xf75   :  { %v2908_v63 = vmul.f32 1.442695, %v2897_v62  ;;  %v2887_v4 = vpop.xlane.xlu1 %2886 }
 0xf76   :  { %v2899_v29 = vsub.f32 %v2867_v38, %v2887_v4  ;;  %v2878_v6 = vpop.xlane.xlu0 %2877 }
 0xf77   :  { %4851 = vpow2.f32 %v2908_v63  ;;  %v2896_v27 = vsub.f32 %v2864_v37, %v2878_v6 }
 0xf78   :  { %v2912_v32 = vmul.f32 1.442695, %v2899_v29 }
 0xf79   :  { %v2906_v59 = vmul.f32 1.442695, %v2896_v27  ;;  %v2893_v0 = vpop.xlane.xlu1 %2892 }
 0xf7a   :  { %4853 = vpow2.f32 %v2912_v32  ;;  %v2901_v7 = vsub.f32 %v2869_v49, %v2893_v0  ;;  %v2884_v14 = vpop.xlane.xlu0 %2883 }
 0xf7b   :  { %4855 = vpow2.f32 %v2906_v59  ;;  %v2898_v10 = vsub.f32 %v2866_v48, %v2884_v14 }
 0xf7c   :  { %v4848_v12 = vpop.eup %4847  ;;  %v2916_v13 = vmul.f32 1.442695, %v2901_v7 }
 0xf7d   :  { %v4850_v31 = vpop.eup %4849  ;;  %v2910_v15 = vmul.f32 1.442695, %v2898_v10  ;;  %v2921_v52 = vsel %vm1128_vm8, %v4848_v12, 0.0 }
 0xf7e   :  { %4857 = vpow2.f32 %v2916_v13  ;;  %2922 = vadd.xlane.f32.xlu1 %v2921_v52  ;;  %v2890_v28 = vpop.xlane.xlu0 %2889  ;;  %v2918_v16 = vsel %vm1128_vm8, %v4850_v31, 0.0 }
 0xf7f   :  { %4859 = vpow2.f32 %v2910_v15  ;;  %v2900_v17 = vsub.f32 %v2868_v55, %v2890_v28  ;;  %2919 = vadd.xlane.f32.xlu0 %v2918_v16 }
 0xf81   :  { %v4852_v19 = vpop.eup %4851  ;;  %v2914_v33 = vmul.f32 1.442695, %v2900_v17 }
 0xf82   :  { %v2927_v21 = vsel %vm1128_vm8, %v4852_v19, 0.0 }
 0xf83   :  { %4861 = vpow2.f32 %v2914_v33  ;;  %2928 = vadd.xlane.f32.xlu1 %v2927_v21 }
 0xf84   :  { %v4854_v30 = vpop.eup %4853 }
 0xf85   :  { %v4856_v22 = vpop.eup %4855  ;;  %v2933_v23 = vsel %vm1128_vm8, %v4854_v30, 0.0 }
 0xf86   :  { %v2924_v25 = vsel %vm1128_vm8, %v4856_v22, 0.0 }
 0xf87   :  { %2934 = vadd.xlane.f32.xlu1 %v2933_v23  ;;  %2925 = vadd.xlane.f32.xlu0 %v2924_v25 }
 0xf88   :  { %v4858_v35 = vpop.eup %4857 }
 0xf89   :  { %v4860_v36 = vpop.eup %4859  ;;  %v2939_v37 = vsel %vm1128_vm8, %v4858_v35, 0.0 }
 0xf8a   :  { %v2930_v38 = vsel %vm1128_vm8, %v4860_v36, 0.0 }
 0xf8b   :  { %2940 = vadd.xlane.f32.xlu1 %v2939_v37  ;;  %2931 = vadd.xlane.f32.xlu0 %v2930_v38  ;;  %v2239_v38 = vld [vmem:[%s5978_s21 + $0x10] sm:$0xff] }
 0xf8d   :  { %v4862_v40 = vpop.eup %4861 }
 0xf8e   :  { %v2936_v41 = vsel %vm1128_vm8, %v4862_v40, 0.0 }
 0xf8f   :  { %2937 = vadd.xlane.f32.xlu0 %v2936_v41 }
0x100b   :  { %v2923_v42 = vpop.xlane.xlu1 %2922 }
0x100c   :  { %4863 = vrcp.f32 %v2923_v42  ;;  %v2920_v43 = vpop.xlane.xlu0 %2919 }
0x100d   :  { %4865 = vrcp.f32 %v2920_v43  ;;  %v3822_v43 = vld [vmem:[%s5979_s22] ss:$0 sm:$0xff] }
0x1010   :  { %v2929_v44 = vpop.xlane.xlu1 %2928 }
0x1011   :  { %4867 = vrcp.f32 %v2929_v44 }
0x1014   :  { %v2935_v45 = vpop.xlane.xlu1 %2934  ;;  %v2926_v46 = vpop.xlane.xlu0 %2925 }
0x1015   :  { %4869 = vrcp.f32 %v2926_v46 }
0x1016   :  { %v4864_v47 = vpop.eup %4863  ;;  %4871 = vrcp.f32 %v2935_v45 }
0x1017   :  { %v4866_v48 = vpop.eup %4865  ;;  %v2951_v53 = vmul.f32 %v4864_v47, %v4848_v12 }
0x1018   :  { %v2932_v49 = vpop.xlane.xlu0 %2931  ;;  %v2950_v50 = vmul.f32 %v4866_v48, %v4850_v31  ;;  %v2941_v54 = vpop.xlane.xlu1 %2940 }
0x1019   :  { %4873 = vrcp.f32 %v2932_v49 }
0x101a   :  { %4471 = vmatprep.mubr.msk.f32.mxu0 %vm1128_vm8, %v2950_v50  ;;  %4875 = vrcp.f32 %v2941_v54 }
0x101b   :  { %4472 = vmatmul.mubr.msk.f32.vlgmr.msra.gmra.mrb[74].mxu0 %vm1128_vm8, %v2951_v53  ;;  %v4868_v61 = vpop.eup %4867 }
0x101c   :  { %v2938_v55 = vpop.xlane.xlu0 %2937  ;;  %4484 = vmatpush3.msra.mxu0 %v4906_v60  ;;  %v2953_v56 = vmul.f32 %v4868_v61, %v4852_v19 }
0x101d   :  { %4877 = vrcp.f32 %v2938_v55 }
0x101f   :  { %v4870_v26 = vpop.eup %4869 }
0x1020   :  { %v2952_v51 = vmul.f32 %v4870_v26, %v4856_v22  ;;  %v4872_v57 = vpop.eup %4871 }
0x1021   :  { %v2955_v63 = vmul.f32 %v4872_v57, %v4854_v30 }
0x1022   :  { %4474 = vmatprep.mubr.msk.f32.mxu0 %vm1128_vm8, %v2952_v51 }
0x1023   :  { %v4874_v58 = vpop.eup %4873  ;;  %4475 = vmatmul.mubr.msk.f32.gmra.mrb[76].mxu0 %vm1128_vm8, %v2953_v56 }
0x1024   :  { %v2954_v24 = vmul.f32 %v4874_v58, %v4860_v36  ;;  %v4876_v62 = vpop.eup %4875  ;;  %v3440_v58 = vld [vmem:[%s5980_s23] sm:$0xff] }
0x1025   :  { %v2957_v6 = vmul.f32 %v4876_v62, %v4858_v35  ;;  %v3442_v62 = vld [vmem:[%s5980_s23 + $0x10] sm:$0xff] }
0x1026   :  { %4477 = vmatprep.mubr.msk.f32.mxu0 %vm1128_vm8, %v2954_v24  ;;  %v3441_v24 = vld [vmem:[%s5980_s23 + $0x8] sm:$0xff] }
0x1027   :  { %v4878_v4 = vpop.eup %4877  ;;  %4478 = vmatmul.mubr.msk.f32.gmra.mrb[78].mxu0 %vm1128_vm8, %v2955_v63  ;;  %v4769_v63 = vpack.c.bf16 %v3441_v24, %v3440_v58 }
0x1028   :  { %v2956_v29 = vmul.f32 %v4878_v4, %v4862_v40  ;;  %v3443_v4 = vld [vmem:[%s5980_s23 + $0x18] sm:$0xff] }
0x1029   :  { %4770 = vmatprep.subr.bf16.mxu0 %v4769_v63 }
0x102a   :  { %4480 = vmatprep.mubr.msk.f32.mxu0 %vm1128_vm8, %v2956_v29  ;;  %v4773_v29 = vpack.c.bf16 %v3443_v4, %v3442_v62 }
0x102b   :  { %4481 = vmatmul.mubr.msk.f32.gmra.mrb[80].mxu0 %vm1128_vm8, %v2957_v6  ;;  %v3534_v6 = vld [vmem:[%s5982_s25] sm:$0xff] }
0x10ee   :  { %v4473_v27 = vpop.f32.mrb[74].mxu0 }
0x10ef   :  { %v3048_v32 = vpop.f32.mrb[75].mxu0 }
0x10f0   :  { %4485 = vmatprep.mubr.msk.f32.mxu0 %vm958_vm6, %v3048_v32  ;;  %v3536_v32 = vld [vmem:[%s5982_s25 + $0x10] sm:$0xff] }
0x10f1   :  { %4486 = vmatmul.mubr.msk.f32.vlgmr.msra.gmra.mrb[82].mxu0 %vm958_vm6, %v4473_v27  ;;  %v3535_v27 = vld [vmem:[%s5982_s25 + $0x8] sm:$0xff] }
0x10f2   :  { %4772 = vmatpush3.bf16.msra.mxu0 %v4769_v63 }
0x10f3   :  { %4774 = vmatprep.subr.bf16.mxu0 %v4773_v29 }
0x10f6   :  { %v4476_v59 = vpop.f32.mrb[76].mxu0  ;;  %4776 = vmatpush3.bf16.msra.mxu0 %v4773_v29 }
0x10f7   :  { %v3058_v0 = vpop.f32.mrb[77].mxu0 }
0x10f8   :  { %4488 = vmatprep.mubr.msk.f32.mxu0 %vm958_vm6, %v3058_v0  ;;  %v3537_v0 = vld [vmem:[%s5982_s25 + $0x18] sm:$0xff] }
0x10f9   :  { %4489 = vmatmul.mubr.msk.f32.gmra.mrb[84].mxu0 %vm958_vm6, %v4476_v59  ;;  %v4777_v59 = vpack.c.bf16 %v3535_v27, %v3534_v6 }
0x10fa   :  { %v4479_v7 = vpop.f32.mrb[78].mxu0 }
0x10fb   :  { %v3068_v14 = vpop.f32.mrb[79].mxu0 }
0x10fc   :  { %4491 = vmatprep.mubr.msk.f32.mxu0 %vm958_vm6, %v3068_v14  ;;  %v3538_v14 = vld [vmem:[%s5982_s25 + $0x20] sm:$0xff] }
0x10fd   :  { %4492 = vmatmul.mubr.msk.f32.gmra.mrb[86].mxu0 %vm958_vm6, %v4479_v7  ;;  %v4781_v7 = vpack.c.bf16 %v3537_v0, %v3536_v32 }
0x10fe   :  { %v4482_v10 = vpop.f32.mrb[80].mxu0 }
0x10ff   :  { %v3078_v12 = vpop.f32.mrb[81].mxu0 }
0x1100   :  { %4494 = vmatprep.mubr.msk.f32.mxu0 %vm958_vm6, %v3078_v12 }
0x1101   :  { %4495 = vmatmul.mubr.msk.f32.gmra.mrb[88].mxu0 %vm958_vm6, %v4482_v10  ;;  %v3539_v10 = vld [vmem:[%s5982_s25 + $0x28] sm:$0xff] }
0x1102   :  { %v4785_v12 = vpack.c.bf16 %v3539_v10, %v3538_v14 }
0x11c4   :  { %v4487_v13 = vpop.f32.mrb[82].mxu0 }
0x11c5   :  { %v3217_v31 = vmul.f32 %v5674_v5, %v4487_v13  ;;  %v3177_v15 = vpop.f32.mrb[83].mxu0 }
0x11c6   :  { %v3216_v52 = vmul.f32 %v5668_v3, %v3177_v15 }
0x11c8   :  { %v4745_v28 = vpack.c.bf16 %v3217_v31, %v3216_v52 }
0x11ca   :  { %4746 = vmatprep.subr.bf16.mxu1 %v4745_v28 }
0x11cb   :  { %4748 = vmatpush3.bf16.msra.mxu1 %v4745_v28 }
0x11cc   :  { %v4490_v16 = vpop.f32.mrb[84].mxu0 }
0x11cd   :  { %v3219_v17 = vmul.f32 %v5689_v11, %v4490_v16  ;;  %v3187_v19 = vpop.f32.mrb[85].mxu0  ;;  %v2237_v11 = vld [vmem:[%s5978_s21] sm:$0xff] }
0x11ce   :  { %v3218_v33 = vmul.f32 %v5682_v1, %v3187_v19  ;;  %v2238_v1 = vld [vmem:[%s5978_s21 + $0x8] sm:$0xff] }
0x11cf   :  { %v4761_v37 = vpack.c.bf16 %v2238_v1, %v2237_v11 }
0x11d0   :  { %v4749_v21 = vpack.c.bf16 %v3219_v17, %v3218_v33  ;;  %v4493_v30 = vpop.f32.mrb[86].mxu0 }
0x11d1   :  { %v3221_v22 = vmul.f32 %v5705_v20, %v4493_v30  ;;  %v3197_v23 = vpop.f32.mrb[87].mxu0 }
0x11d2   :  { %v3220_v25 = vmul.f32 %v5698_v2, %v3197_v23  ;;  %4750 = vmatprep.subr.bf16.mxu1 %v4749_v21 }
0x11d3   :  { %4752 = vmatpush3.bf16.msra.mxu1 %v4749_v21 }
0x11d4   :  { %v4753_v5 = vpack.c.bf16 %v3221_v22, %v3220_v25  ;;  %v4496_v3 = vpop.f32.mrb[88].mxu0 }
0x11d5   :  { %v3223_v35 = vmul.f32 %v5722_v39, %v4496_v3  ;;  %v3207_v36 = vpop.f32.mrb[89].mxu0  ;;  %v2240_v39 = vld [vmem:[%s5978_s21 + $0x18] sm:$0xff] }
0x11d6   :  { %v3222_v20 = vmul.f32 %v5716_v18, %v3207_v36  ;;  %4754 = vmatprep.subr.bf16.mxu1 %v4753_v5  ;;  %v4765_v40 = vpack.c.bf16 %v2240_v39, %v2239_v38  ;;  %v4907_v18 = vld [vmem:[%s6018_s13 + $0x8] sm:$0xff]  ;;  %v4908_v36 = vld [vmem:[%s6011_s30] sm:$0x7] }
0x11d7   :  { %4756 = vmatpush3.bf16.msra.mxu1 %v4753_v5 }
0x11d8   :  { %v4757_v2 = vpack.c.bf16 %v3223_v35, %v3222_v20  ;;  %v3428_v35 = vsub.s32 2, %v5109_v34  ;;  %v3540_v34 = vld [vmem:[%s5982_s25 + $0x30] sm:$0xff] }
0x11da   :  { %4758 = vmatprep.subr.bf16.mxu1 %v4757_v2  ;;  %v3429_v11 = vrot.slane %v4908_v36, %v3428_v35 }
0x11db   :  { %4760 = vmatpush3.bf16.msra.mxu1 %v4757_v2 }
0x11dc   :  { %4762 = vmatprep.subr.bf16.mxu1 %v4761_v37 }
0x11de   :  { %4514 = vmatmul.mubr.msk.f32.vlgmr.msra.gmra.mrb[58].mxu1 %vm1128_vm8, %v4907_v18 }
0x11df   :  { %4764 = vmatpush3.bf16.msra.mxu1 %v4761_v37  ;;  %v4909_v37 = vld [vmem:[%s5969_s12] sm:$0x7] }
0x11e0   :  { %4766 = vmatprep.subr.bf16.mxu1 %v4765_v40  ;;  %v3437_v38 = vrot.slane %v4909_v37, %v3428_v35 }
0x11e3   :  { %4768 = vmatpush3.bf16.msra.mxu1 %v4765_v40 }
0x11e4   :  { %4778 = vmatprep.subr.bf16.mxu1 %v4777_v59 }
0x12b1   :  { %v4515_v41 = vpop.f32.mrb[58].mxu1 }
0x12b2   :  { %v3290_v42 = vpop.f32.mrb[59].mxu1 }
0x12b3   :  { %4524 = vmatprep.mubr.msk.f32.mxu1 %vm122_vm0, %v3290_v42 }
0x12b4   :  { %4525 = vmatmul.mubr.msk.f32.vlgmr.msra.gmra.mrb[60].mxu1 %vm122_vm0, %v4515_v41 }
0x12b5   :  { %4780 = vmatpush3.bf16.msra.mxu1 %v4777_v59 }
0x12b6   :  { %4782 = vmatprep.subr.bf16.mxu1 %v4781_v7 }
0x12b9   :  { %4784 = vmatpush3.bf16.msra.mxu1 %v4781_v7 }
0x12ba   :  { %4786 = vmatprep.subr.bf16.mxu1 %v4785_v12 }
0x12bd   :  { %4788 = vmatpush3.bf16.msra.mxu1 %v4785_v12 }
0x1387   :  { %v4526_v44 = vpop.f32.mrb[60].mxu1 }
0x1388   :  { %v3383_v45 = vadd.f32 %v4526_v44, %v3822_v43  ;;  %v3377_v46 = vpop.f32.mrb[61].mxu1 }
0x1389   :  { %v3378_v47 = vadd.f32 %v3822_v43, %v3377_v46  ;;  %v3541_v43 = vld [vmem:[%s5982_s25 + $0x38] sm:$0xff] }
0x138a   :  { %v5875_v48 = vadd.f32 %v3383_v45, %v5469_v8  ;;  %v4789_v44 = vpack.c.bf16 %v3541_v43, %v3540_v34  ;;  %v3825_v45 = vld [vmem:[%s5981_s24] ss:$0 sm:$0xff]  ;;  %s4910_s24 = scalar_lea.vmem %s3642_s11, 256 }
0x138b   :  { %v5878_v49 = vadd.f32 %v3378_v47, %v5474_v9  ;;  %p4911_p0 = scmp.ne.s32.totalorder %s3642_s11, %s4910_s24  ;;  %p4916_p2 = scmp.lt.s32.totalorder %s4910_s24, %s4910_s24 }
0x138c   :  { %v3391_v50 = vsel %vm122_vm0, %v5875_v48, 0.0  ;;  %4790 = vmatprep.subr.bf16.mxu1 %v4789_v44 }
0x138d   :  { %3392 = vadd.xlane.f32.xlu1 %v3391_v50  ;;  %v3388_v53 = vsel %vm122_vm0, %v5878_v49, 0.0  ;;  %4792 = vmatpush3.bf16.msra.mxu1 %v4789_v44  ;;  %p4917_p3 = por %p4916_p2, %p4915_p1 }
0x138e   :  { %3389 = vadd.xlane.f32.xlu0 %v3388_v53 }
0x138f   :  { %p4918_p4 = pnand %p4917_p3, %p4911_p0 }
0x141a   :  { %v3393_v54 = vpop.xlane.xlu1 %3392 }
0x141b   :  { %v3395_v55 = vmul.f32 0.03125, %v3393_v54  ;;  %v3390_v60 = vpop.xlane.xlu0 %3389 }
0x141c   :  { %v3394_v61 = vmul.f32 0.03125, %v3390_v60 }
0x141d   :  { %v3397_v26 = vsub.f32 %v5875_v48, %v3395_v55 }
0x141e   :  { %v3396_v8 = vsub.f32 %v5878_v49, %v3394_v61  ;;  %v3830_v61 = vld [vmem:[%s5983_s26] ss:$0 sm:$0xff] }
0x141f   :  { %v3399_v51 = vmul.f32 %v3397_v26, %v3397_v26  ;;  %v3431_v1 = vmul.f32 %v3429_v11, %v3397_v26 }
0x1420   :  { %v3398_v56 = vmul.f32 %v3396_v8, %v3396_v8  ;;  %v3430_v2 = vmul.f32 %v3429_v11, %v3396_v8 }
0x1421   :  { %v3403_v9 = vsel %vm122_vm0, %v3399_v51, 0.0 }
0x1422   :  { %3404 = vadd.xlane.f32.xlu1 %v3403_v9  ;;  %v3400_v57 = vsel %vm122_vm0, %v3398_v56, 0.0 }
0x1423   :  { %3401 = vadd.xlane.f32.xlu0 %v3400_v57 }
0x14af   :  { %v3405_v13 = vpop.xlane.xlu1 %3404 }
0x14b0   :  { %v3407_v31 = vmul.f32 0.032258064, %v3405_v13  ;;  %v3402_v15 = vpop.xlane.xlu0 %3401 }
0x14b1   :  { %v3406_v52 = vmul.f32 0.032258064, %v3402_v15 }
0x14b2   :  { %4879 = vrsqrt.f32 %v3407_v31  ;;  %vm3417_vm13 = vcmp.eq.f32.partialorder %v3407_v31, inf  ;;  %v3420_v19 = vand.u32 2147483648, %v3407_v31  ;;  %vm3419_vm14 = vcmp.eq.f32.partialorder %v3407_v31, 0.0 }
0x14b3   :  { %4881 = vrsqrt.f32 %v3406_v52  ;;  %vm3410_vm15 = vcmp.eq.f32.partialorder %v3406_v52, inf  ;;  %v3413_v30 = vand.u32 2147483648, %v3406_v52  ;;  %vm3412_vm1 = vcmp.eq.f32.partialorder %v3406_v52, 0.0 }
0x14bc   :  { %v4880_v28 = vpop.eup %4879 }
0x14bd   :  { %v4882_v16 = vpop.eup %4881  ;;  %v3416_v17 = vmul.f32 %v4880_v28, %v3407_v31 }
0x14be   :  { %v3409_v33 = vmul.f32 %v4882_v16, %v3406_v52 }
0x14bf   :  { %v3418_v21 = vsel %vm3417_vm13, %v3407_v31, %v3416_v17 }
0x14c0   :  { %v3421_v22 = vsel %vm3419_vm14, %v3420_v19, %v3418_v21  ;;  %v3411_v23 = vsel %vm3410_vm15, %v3406_v52, %v3409_v33 }
0x14c1   :  { %v3423_v25 = vadd.f32 1e-06, %v3421_v22  ;;  %v3414_v5 = vsel %vm3412_vm1, %v3413_v30, %v3411_v23 }
0x14c2   :  { %v3422_v3 = vadd.f32 1e-06, %v3414_v5 }
0x14c3   :  { %4883 = vrcp.f32 %v3423_v25 }
0x14c4   :  { %4885 = vrcp.f32 %v3422_v3 }
0x14cd   :  { %v4884_v20 = vpop.eup %4883 }
0x14ce   :  { %v4886_v39 = vpop.eup %4885  ;;  %v3433_v40 = vmul.f32 %v4884_v20, %v3431_v1 }
0x14cf   :  { %v3432_v18 = vmul.f32 %v4886_v39, %v3430_v2 }
0x14d0   :  { %v3439_v42 = vadd.f32 %v3437_v38, %v3433_v40 }
0x14d1   :  { %v3438_v41 = vadd.f32 %v3437_v38, %v3432_v18 }
0x14d3   :  { %4535 = vmatprep.mubr.msk.f32.mxu0 %vm122_vm0, %v3438_v41 }
0x14d4   :  { %4536 = vmatmul.mubr.msk.f32.vlgmr.msra.gmra.mrb[90].mxu0 %vm122_vm0, %v3439_v42 }
0x15a7   :  { %v4537_v46 = vpop.f32.mrb[90].mxu0 }
0x15a8   :  { %v3529_v47 = vadd.f32 %v4537_v46, %v3825_v45  ;;  %v3523_v50 = vpop.f32.mrb[91].mxu0 }
0x15a9   :  { %v3524_v53 = vadd.f32 %v3825_v45, %v3523_v50 }
0x15aa   :  { %v3533_v55 = vmax.f32 %v3529_v47, 0.0 }
0x15ab   :  { %v3532_v54 = vmax.f32 %v3524_v53, 0.0 }
0x15ad   :  { %4554 = vmatprep.mubr.msk.f32.mxu1 %vm1128_vm8, %v3532_v54 }
0x15ae   :  { %4555 = vmatmul.mubr.msk.f32.vlgmr.msra.gmra.mrb[62].mxu1 %vm1128_vm8, %v3533_v55 }
0x1681   :  { %v4556_v60 = vpop.f32.mrb[62].mxu1 }
0x1682   :  { %v3624_v26 = vadd.f32 %v4556_v60, %v5875_v48  ;;  %v3614_v8 = vpop.f32.mrb[63].mxu1 }
0x1683   :  { %v3623_v51 = vadd.f32 %v3614_v8, %v5878_v49 }
0x1684   :  { %v3633_v56 = vadd.f32 %v3830_v61, %v3624_v26 }
0x1685   :  { %v3632_v9 = vadd.f32 %v3830_v61, %v3623_v51 }
0x1686   :  { %3635 = vst.msk [vmem:[#allocation2 + $0x8] sm:$0xff] %vm122_vm0, %v3633_v56 }
0x1687   :  { %3634 = vst.msk [vmem:[#allocation2] sm:$0xff] %vm122_vm0, %v3632_v9 }
0x1688   :  { %4921 = shalt.err (!%p4918_p4)
}
0x1689   :  { %s4922_s28 = scalar_lea.hbm %s5984_s27, 256 }
0x168a   :  { %p4923_p5 = scmp.ne.s32.totalorder %s5984_s27, %s4922_s28  ;;  %p4926_p6 = scmp.lt.u32.totalorder %s4922_s28, %s5984_s27 }
0x168c   :  { %p4928_p7 = pnand %p4926_p6, %p4923_p5 }
0x168e   :  { %4931 = shalt.err (!%p4928_p7)
}
0x168f   :  { %s4938_s3 = smov 128   ;;  %s4939_s8 = smov 8  }
0x1690   :  { %3647 = dma.vmem_to_hbm [thread:$0]  %s3642_s11, 256, %s5984_s27, [#allocation3], %s4938_s3, %s4938_s3, %s4939_s8  }
0x1691   :  { %4932 = dma.done.wait [#allocation3], 256  }
0x1692   :  { %4933 = vsyncadd [#allocation3], 4294967040 }
0x1693   :  { %3651 = vsyncpa [#allocation3], 1 }

</bundles_post_ra>
